<compile_context>
chip_gen: v7x
topology: tpu7x:2x2x1
jax: 0.10.0
libtpu: 0.0.40
codegen_flags: <defaults>
</compile_context>

<pallas_src>
import functools

import numpy as np
import jax
import jax.numpy as jnp
from jax.experimental import pallas as pl
from jax.experimental.pallas import tpu as pltpu


_K = 5      # conv kernel size (both conv layers)
_LB = 128   # lanes per ow-parity block in the banded conv output (one lane tile)


def _round_up(x, m):
    return ((x + m - 1) // m) * m


# ----------------------------------------------------------------------------
# Host-side weight re-layouts (tiny, run once per call under jit)
# ----------------------------------------------------------------------------
def _banded_conv_weights(w, w_in, r_pad):
    """(Cout,Cin,K,K) torch conv weight -> (K, r_pad, 2*_LB) banded matrices.

    For each kh, column index of the contraction is w_col*Cin + ci (rows beyond
    w_in*Cin are zero).  Output lane index is parity*_LB + pw*Cout + co with
    ow = 2*pw + parity (lanes beyond PW*Cout in each half are zero), so the
    2x2 width pooling becomes a max of the two aligned 128-lane halves.
    """
    cout, cin, k, _ = w.shape
    ow_n = w_in - k + 1
    pw_n = ow_n // 2
    r = np.arange(r_pad)
    w_col, ci = r // cin, r % cin
    l = np.arange(2 * _LB)
    parity, rem = l // _LB, l % _LB
    pw, co = rem // cout, rem % cout
    ow = 2 * pw + parity
    kw = w_col[:, None] - ow[None, :]
    valid = ((kw >= 0) & (kw < k)
             & (rem < pw_n * cout)[None, :]
             & (r < w_in * cin)[:, None])
    kwc = np.clip(kw, 0, k - 1)
    kh = np.arange(k)
    vals = w[co[None, None, :], ci[None, :, None], kh[:, None, None], kwc[None, :, :]]
    return jnp.where(jnp.asarray(valid)[None], vals, 0.0)          # (K, r_pad, 256)


def _fc1_weights(fw1):
    """(120, 400) torch fc1 -> (5, 128, 120) indexed by [ph, pw*16+co, n].

    Folds torch.flatten's (c, h, w) ordering into the weight; rows >= 80 are 0.
    """
    lane = np.arange(_LB)
    pw, co = lane // 16, lane % 16
    ph = np.arange(5)
    col = np.clip(co[None, :] * 25 + ph[:, None] * 5 + pw[None, :], 0, 399)  # (5,128)
    w = fw1.T[col]                                                           # (5,128,120)
    return jnp.where(jnp.asarray(lane < 80)[None, :, None], w, 0.0)


def _padded_bias(b, reps):
    """per-channel bias -> (1, 128) lane vector ordered pw*Cout + co, zero-padded."""
    v = jnp.tile(b, reps)
    v = jnp.concatenate([v, jnp.zeros((_LB - v.shape[0],), jnp.float32)])
    return v.reshape(1, _LB)


# ----------------------------------------------------------------------------
# The fused network kernel
# ----------------------------------------------------------------------------
def _net_kernel(x_ref, wb1_ref, b1_ref, wb2_ref, b2_ref, w1r_ref, fb1_ref,
                w2_ref, fb2_ref, w3_ref, fb3_ref, o_ref,
                m1_scr, m2_scr, h2_scr, *, bt):
    """One batch block (bt images): conv1+pool -> conv2+pool -> fc1 -> fc2 -> fc3.

    x_ref   : (bt, 32, 96)   per-image rows layout, lane index = w*3 + c
    wb1_ref : (5, 96, 256)   banded conv1 weights (output lanes: parity*128+pw*6+co)
    wb2_ref : (5, 128, 256)  banded conv2 weights (output lanes: parity*128+pw*16+co)
    w1r_ref : (5, 128, 120)  fc1 weights, [ph, pw*16+co, n]
    o_ref   : (bt, 1, 10)
    """
    # ---------------- conv stages, one image at a time (bt small & static) ----
    for b in range(bt):
        # conv1: 5 accumulating dots (28,96)x(96,256), contraction 96 in one pass.
        acc1 = jnp.dot(x_ref[b, pl.ds(0, 28), :], wb1_ref[0],
                       preferred_element_type=jnp.float32)
        for kh in range(1, _K):
            acc1 = acc1 + jnp.dot(x_ref[b, pl.ds(kh, 28), :], wb1_ref[kh],
                                  preferred_element_type=jnp.float32)
        # 2x2/2 max-pool: width = max of the two aligned parity halves,
        # height = max of two stride-2 sublane reads.  Bias+ReLU after the pool
        # is valid (per-channel constant bias + monotone ReLU).
        m1_scr[...] = jnp.maximum(acc1[:, 0:_LB], acc1[:, _LB:2 * _LB])   # (28,128)
        p1 = jnp.maximum(m1_scr[pl.ds(0, 14, stride=2), :],
                         m1_scr[pl.ds(1, 14, stride=2), :])               # (14,128)
        h1 = jnp.maximum(p1 + b1_ref[...], 0.0)                           # (14,128)

        # conv2: 5 accumulating dots (10,128)x(128,256); zero-padded rows/lanes
        # of the banded weights keep the padding lanes of h1 harmless.
        acc2 = jnp.dot(h1[0:10, :], wb2_ref[0], preferred_element_type=jnp.float32)
        for kh in range(1, _K):
            acc2 = acc2 + jnp.dot(h1[kh:kh + 10, :], wb2_ref[kh],
                                  preferred_element_type=jnp.float32)
        m2_scr[...] = jnp.maximum(acc2[:, 0:_LB], acc2[:, _LB:2 * _LB])   # (10,128)
        p2 = jnp.maximum(m2_scr[pl.ds(0, 5, stride=2), :],
                         m2_scr[pl.ds(1, 5, stride=2), :])                # (5,128)
        h2 = jnp.maximum(p2 + b2_ref[...], 0.0)                           # (5,128)
        h2_scr[pl.ds(b * 5, 5), :] = h2                                   # rows 5b..5b+4

    # ---------------- fused MLP head, batched over the block ------------------
    # fc1: accumulate over the 5 pooled rows; rows of image b sit at 5b+ph, so a
    # stride-5 read gathers the (bt, 128) matrix for a given ph.
    f1 = jnp.dot(h2_scr[pl.ds(0, bt, stride=5), :], w1r_ref[0],
                 preferred_element_type=jnp.float32)
    for ph in range(1, 5):
        f1 = f1 + jnp.dot(h2_scr[pl.ds(ph, bt, stride=5), :], w1r_ref[ph],
                          preferred_element_type=jnp.float32)
    h = jnp.maximum(f1 + fb1_ref[...], 0.0)                               # (bt,120)
    h = jnp.maximum(jnp.dot(h, w2_ref[...], preferred_element_type=jnp.float32)
                    + fb2_ref[...], 0.0)                                  # (bt,84)
    logits = (jnp.dot(h, w3_ref[...], preferred_element_type=jnp.float32)
              + fb3_ref[...])                                             # (bt,10)
    for b in range(bt):
        o_ref[b] = logits[b:b + 1, :]


# ----------------------------------------------------------------------------
# Net: parameters + forward
# ----------------------------------------------------------------------------
def init_params(key):
    def conv_init(k, cout, cin, ks):
        k1, k2 = jax.random.split(k)
        bound = 1.0 / np.sqrt(cin * ks * ks)
        w = jax.random.uniform(k1, (cout, cin, ks, ks), jnp.float32, -bound, bound)
        b = jax.random.uniform(k2, (cout,), jnp.float32, -bound, bound)
        return w, b

    def fc_init(k, fin, fout):
        k1, k2 = jax.random.split(k)
        bound = 1.0 / np.sqrt(fin)
        w = jax.random.uniform(k1, (fout, fin), jnp.float32, -bound, bound)
        b = jax.random.uniform(k2, (fout,), jnp.float32, -bound, bound)
        return w, b

    keys = jax.random.split(key, 5)
    return {
        "conv1": conv_init(keys[0], 6, 3, 5),
        "conv2": conv_init(keys[1], 16, 6, 5),
        "fc1": fc_init(keys[2], 16 * 5 * 5, 120),
        "fc2": fc_init(keys[3], 120, 84),
        "fc3": fc_init(keys[4], 84, 10),
    }


def net_forward(params, x):
    B = x.shape[0]
    w1, b1 = params["conv1"]
    w2, b2 = params["conv2"]
    fw1, fb1 = params["fc1"]
    fw2, fb2 = params["fc2"]
    fw3, fb3 = params["fc3"]

    # Host-side weight re-layouts (conv -> banded matmul weights, fc1 permute).
    wb1 = _banded_conv_weights(w1, 32, 96)      # (5, 96, 256)
    wb2 = _banded_conv_weights(w2, 14, _LB)     # (5, 128, 256)
    b1p = _padded_bias(b1, 14)                  # (1, 128)
    b2p = _padded_bias(b2, 5)                   # (1, 128)
    w1r = _fc1_weights(fw1)                     # (5, 128, 120)

    # One NCHW -> rows (H, W*C) relayout of the network input.
    xrow = x.transpose(0, 2, 3, 1).reshape(B, 32, 96)

    # Batch blocking: keep >=2 grid steps whenever B >= 2 (v7x has 2 TCs),
    # cap the block at 8 images (keeps per-step VMEM ~3.5 MB on all gens).
    bt = max(1, min(8, (B + 1) // 2))
    Bp = _round_up(B, bt)
    if Bp != B:
        xrow = jnp.pad(xrow, ((0, Bp - B), (0, 0), (0, 0)))

    kern = functools.partial(_net_kernel, bt=bt)
    out = pl.pallas_call(
        kern,
        out_shape=jax.ShapeDtypeStruct((Bp, 1, 10), jnp.float32),
        grid=(Bp // bt,),
        in_specs=[
            pl.BlockSpec((bt, 32, 96), lambda i: (i, 0, 0)),
            pl.BlockSpec((_K, 96, 2 * _LB), lambda i: (0, 0, 0)),
            pl.BlockSpec((1, _LB), lambda i: (0, 0)),
            pl.BlockSpec((_K, _LB, 2 * _LB), lambda i: (0, 0, 0)),
            pl.BlockSpec((1, _LB), lambda i: (0, 0)),
            pl.BlockSpec((5, _LB, 120), lambda i: (0, 0, 0)),
            pl.BlockSpec((1, 120), lambda i: (0, 0)),
            pl.BlockSpec((120, 84), lambda i: (0, 0)),
            pl.BlockSpec((1, 84), lambda i: (0, 0)),
            pl.BlockSpec((84, 10), lambda i: (0, 0)),
            pl.BlockSpec((1, 10), lambda i: (0, 0)),
        ],
        out_specs=pl.BlockSpec((bt, 1, 10), lambda i: (i, 0, 0)),
        scratch_shapes=[
            pltpu.VMEM((28, _LB), jnp.float32),      # conv1 width-pooled map
            pltpu.VMEM((10, _LB), jnp.float32),      # conv2 width-pooled map
            pltpu.VMEM((bt * 5, _LB), jnp.float32),  # pooled conv2 rows per image
        ],
        compiler_params=pltpu.CompilerParams(dimension_semantics=("parallel",)),
    )(xrow, wb1, b1p, wb2, b2p, w1r, fb1.reshape(1, 120),
      fw2.T, fb2.reshape(1, 84), fw3.T, fb3.reshape(1, 10))
    return out.reshape(Bp, 10)[:B]


# ----------------------------------------------------------------------------
# Pure-JAX reference for correctness checking.
# ----------------------------------------------------------------------------
def reference_forward(params, x):
    def conv(x, w, b):
        y = jax.lax.conv_general_dilated(
            x, w, (1, 1), "VALID", dimension_numbers=("NCHW", "OIHW", "NCHW"))
        return jax.nn.relu(y + b.reshape(1, -1, 1, 1))

    def pool(x):
        return jax.lax.reduce_window(x, -jnp.inf, jax.lax.max,
                                     (1, 1, 2, 2), (1, 1, 2, 2), "VALID")

    w1, b1 = params["conv1"]
    w2, b2 = params["conv2"]
    fw1, fb1 = params["fc1"]
    fw2, fb2 = params["fc2"]
    fw3, fb3 = params["fc3"]
    x = pool(conv(x, w1, b1))
    x = pool(conv(x, w2, b2))
    x = x.reshape(x.shape[0], -1)
    x = jax.nn.relu(x @ fw1.T + fb1)
    x = jax.nn.relu(x @ fw2.T + fb2)
    return x @ fw3.T + fb3


if __name__ == "__main__":
    x = jax.random.normal(jax.random.PRNGKey(0), (2, 3, 32, 32), dtype=jnp.float32)
    params = init_params(jax.random.PRNGKey(42))

    fwd = jax.jit(net_forward)
    out = jax.block_until_ready(fwd(params, x))
    assert out.shape == (2, 10) and out.dtype == jnp.float32

    ref = jax.block_until_ready(reference_forward(params, x))
    np.testing.assert_allclose(np.asarray(out), np.asarray(ref), rtol=1e-4, atol=1e-4)

    print("KERNEL_OK")
</pallas_src>

<mosaic_0001>
module attributes {stable_mosaic.version = 11 : i64} {
  func.func @_net_kernel(%arg0: i32, %arg1: memref<1x32x96xf32, #tpu.memory_space<vmem>>, %arg2: memref<5x96x256xf32, #tpu.memory_space<vmem>>, %arg3: memref<1x128xf32, #tpu.memory_space<vmem>>, %arg4: memref<5x128x256xf32, #tpu.memory_space<vmem>>, %arg5: memref<1x128xf32, #tpu.memory_space<vmem>>, %arg6: memref<5x128x120xf32, #tpu.memory_space<vmem>>, %arg7: memref<1x120xf32, #tpu.memory_space<vmem>>, %arg8: memref<120x84xf32, #tpu.memory_space<vmem>>, %arg9: memref<1x84xf32, #tpu.memory_space<vmem>>, %arg10: memref<84x10xf32, #tpu.memory_space<vmem>>, %arg11: memref<1x10xf32, #tpu.memory_space<vmem>>, %arg12: memref<1x1x10xf32, #tpu.memory_space<vmem>>, %arg13: memref<28x128xf32, #tpu.memory_space<vmem>>, %arg14: memref<10x128xf32, #tpu.memory_space<vmem>>, %arg15: memref<5x128xf32, #tpu.memory_space<vmem>>) attributes {dimension_semantics = [#tpu.dimension_semantics<parallel>], iteration_bounds = array<i64: 2>, scalar_prefetch = 0 : i64, scratch_operands = 3 : i64, tpu.core_type = #tpu.core_type<tc>, window_params = [{transform_indices = @transform_0, window_bounds = array<i64: 1, 32, 96>}, {pipeline_mode = #tpu.pipeline_mode<synchronous>, transform_indices = @transform_1, window_bounds = array<i64: 5, 96, 256>}, {pipeline_mode = #tpu.pipeline_mode<synchronous>, transform_indices = @transform_2, window_bounds = array<i64: 1, 128>}, {pipeline_mode = #tpu.pipeline_mode<synchronous>, transform_indices = @transform_3, window_bounds = array<i64: 5, 128, 256>}, {pipeline_mode = #tpu.pipeline_mode<synchronous>, transform_indices = @transform_4, window_bounds = array<i64: 1, 128>}, {pipeline_mode = #tpu.pipeline_mode<synchronous>, transform_indices = @transform_5, window_bounds = array<i64: 5, 128, 120>}, {pipeline_mode = #tpu.pipeline_mode<synchronous>, transform_indices = @transform_6, window_bounds = array<i64: 1, 120>}, {pipeline_mode = #tpu.pipeline_mode<synchronous>, transform_indices = @transform_7, window_bounds = array<i64: 120, 84>}, {pipeline_mode = #tpu.pipeline_mode<synchronous>, transform_indices = @transform_8, window_bounds = array<i64: 1, 84>}, {pipeline_mode = #tpu.pipeline_mode<synchronous>, transform_indices = @transform_9, window_bounds = array<i64: 84, 10>}, {pipeline_mode = #tpu.pipeline_mode<synchronous>, transform_indices = @transform_10, window_bounds = array<i64: 1, 10>}, {transform_indices = @transform_11, window_bounds = array<i64: 1, 1, 10>}]} {
    %c0 = arith.constant 0 : index
    %c0_0 = arith.constant 0 : index
    %c0_1 = arith.constant 0 : index
    %0 = vector.load %arg1[%c0, %c0_0, %c0_1] : memref<1x32x96xf32, #tpu.memory_space<vmem>>, vector<1x28x96xf32>
    %1 = vector.shape_cast %0 : vector<1x28x96xf32> to vector<28x96xf32>
    %c0_2 = arith.constant 0 : index
    %c0_3 = arith.constant 0 : index
    %c0_4 = arith.constant 0 : index
    %2 = vector.load %arg2[%c0_2, %c0_3, %c0_4] : memref<5x96x256xf32, #tpu.memory_space<vmem>>, vector<1x96x256xf32>
    %3 = vector.shape_cast %2 : vector<1x96x256xf32> to vector<96x256xf32>
    %cst = arith.constant dense<0.000000e+00> : vector<28x256xf32>
    %4 = tpu.matmul %1, %3, %cst {dimension_numbers = #tpu.dot_dimension_numbers<[1], [0], [0], [1], [0, 0, 1, 1], [], []>} : vector<28x96xf32>, vector<96x256xf32>, vector<28x256xf32> -> vector<28x256xf32>
    %c0_5 = arith.constant 0 : index
    %c1 = arith.constant 1 : index
    %c0_6 = arith.constant 0 : index
    %5 = vector.load %arg1[%c0_5, %c1, %c0_6] : memref<1x32x96xf32, #tpu.memory_space<vmem>>, vector<1x28x96xf32>
    %6 = vector.shape_cast %5 : vector<1x28x96xf32> to vector<28x96xf32>
    %c1_7 = arith.constant 1 : index
    %c0_8 = arith.constant 0 : index
    %c0_9 = arith.constant 0 : index
    %7 = vector.load %arg2[%c1_7, %c0_8, %c0_9] : memref<5x96x256xf32, #tpu.memory_space<vmem>>, vector<1x96x256xf32>
    %8 = vector.shape_cast %7 : vector<1x96x256xf32> to vector<96x256xf32>
    %cst_10 = arith.constant dense<0.000000e+00> : vector<28x256xf32>
    %9 = tpu.matmul %6, %8, %cst_10 {dimension_numbers = #tpu.dot_dimension_numbers<[1], [0], [0], [1], [0, 0, 1, 1], [], []>} : vector<28x96xf32>, vector<96x256xf32>, vector<28x256xf32> -> vector<28x256xf32>
    %10 = arith.addf %4, %9 : vector<28x256xf32>
    %c0_11 = arith.constant 0 : index
    %c2 = arith.constant 2 : index
    %c0_12 = arith.constant 0 : index
    %11 = vector.load %arg1[%c0_11, %c2, %c0_12] : memref<1x32x96xf32, #tpu.memory_space<vmem>>, vector<1x28x96xf32>
    %12 = vector.shape_cast %11 : vector<1x28x96xf32> to vector<28x96xf32>
    %c2_13 = arith.constant 2 : index
    %c0_14 = arith.constant 0 : index
    %c0_15 = arith.constant 0 : index
    %13 = vector.load %arg2[%c2_13, %c0_14, %c0_15] : memref<5x96x256xf32, #tpu.memory_space<vmem>>, vector<1x96x256xf32>
    %14 = vector.shape_cast %13 : vector<1x96x256xf32> to vector<96x256xf32>
    %cst_16 = arith.constant dense<0.000000e+00> : vector<28x256xf32>
    %15 = tpu.matmul %12, %14, %cst_16 {dimension_numbers = #tpu.dot_dimension_numbers<[1], [0], [0], [1], [0, 0, 1, 1], [], []>} : vector<28x96xf32>, vector<96x256xf32>, vector<28x256xf32> -> vector<28x256xf32>
    %16 = arith.addf %10, %15 : vector<28x256xf32>
    %c0_17 = arith.constant 0 : index
    %c3 = arith.constant 3 : index
    %c0_18 = arith.constant 0 : index
    %17 = vector.load %arg1[%c0_17, %c3, %c0_18] : memref<1x32x96xf32, #tpu.memory_space<vmem>>, vector<1x28x96xf32>
    %18 = vector.shape_cast %17 : vector<1x28x96xf32> to vector<28x96xf32>
    %c3_19 = arith.constant 3 : index
    %c0_20 = arith.constant 0 : index
    %c0_21 = arith.constant 0 : index
    %19 = vector.load %arg2[%c3_19, %c0_20, %c0_21] : memref<5x96x256xf32, #tpu.memory_space<vmem>>, vector<1x96x256xf32>
    %20 = vector.shape_cast %19 : vector<1x96x256xf32> to vector<96x256xf32>
    %cst_22 = arith.constant dense<0.000000e+00> : vector<28x256xf32>
    %21 = tpu.matmul %18, %20, %cst_22 {dimension_numbers = #tpu.dot_dimension_numbers<[1], [0], [0], [1], [0, 0, 1, 1], [], []>} : vector<28x96xf32>, vector<96x256xf32>, vector<28x256xf32> -> vector<28x256xf32>
    %22 = arith.addf %16, %21 : vector<28x256xf32>
    %c0_23 = arith.constant 0 : index
    %c4 = arith.constant 4 : index
    %c0_24 = arith.constant 0 : index
    %23 = vector.load %arg1[%c0_23, %c4, %c0_24] : memref<1x32x96xf32, #tpu.memory_space<vmem>>, vector<1x28x96xf32>
    %24 = vector.shape_cast %23 : vector<1x28x96xf32> to vector<28x96xf32>
    %c4_25 = arith.constant 4 : index
    %c0_26 = arith.constant 0 : index
    %c0_27 = arith.constant 0 : index
    %25 = vector.load %arg2[%c4_25, %c0_26, %c0_27] : memref<5x96x256xf32, #tpu.memory_space<vmem>>, vector<1x96x256xf32>
    %26 = vector.shape_cast %25 : vector<1x96x256xf32> to vector<96x256xf32>
    %cst_28 = arith.constant dense<0.000000e+00> : vector<28x256xf32>
    %27 = tpu.matmul %24, %26, %cst_28 {dimension_numbers = #tpu.dot_dimension_numbers<[1], [0], [0], [1], [0, 0, 1, 1], [], []>} : vector<28x96xf32>, vector<96x256xf32>, vector<28x256xf32> -> vector<28x256xf32>
    %28 = arith.addf %22, %27 : vector<28x256xf32>
    %29 = vector.extract_strided_slice %28 {offsets = [0, 0], sizes = [28, 128], strides = [1, 1]} : vector<28x256xf32> to vector<28x128xf32>
    %30 = vector.extract_strided_slice %28 {offsets = [0, 128], sizes = [28, 128], strides = [1, 1]} : vector<28x256xf32> to vector<28x128xf32>
    %31 = arith.maximumf %29, %30 : vector<28x128xf32>
    %c0_29 = arith.constant 0 : index
    %c0_30 = arith.constant 0 : index
    %32 = vector.load %arg13[%c0_29, %c0_30] : memref<28x128xf32, #tpu.memory_space<vmem>>, vector<28x128xf32>
    tpu.vector_store %arg13[%c0_29, %c0_30], %31 {strides = array<i32>} : memref<28x128xf32, #tpu.memory_space<vmem>>, vector<28x128xf32>,
    %c0_31 = arith.constant 0 : index
    %c0_32 = arith.constant 0 : index
    %33 = tpu.strided_load %arg13[%c0_31, %c0_32] {strides = array<i32: 2, 1>} : memref<28x128xf32, #tpu.memory_space<vmem>>, vector<14x128xf32>
    %c1_33 = arith.constant 1 : index
    %c0_34 = arith.constant 0 : index
    %34 = tpu.strided_load %arg13[%c1_33, %c0_34] {strides = array<i32: 2, 1>} : memref<28x128xf32, #tpu.memory_space<vmem>>, vector<14x128xf32>
    %35 = arith.maximumf %33, %34 : vector<14x128xf32>
    %c0_35 = arith.constant 0 : index
    %c0_36 = arith.constant 0 : index
    %36 = vector.load %arg3[%c0_35, %c0_36] : memref<1x128xf32, #tpu.memory_space<vmem>>, vector<1x128xf32>
    %37 = vector.broadcast %36 : vector<1x128xf32> to vector<14x128xf32>
    %38 = arith.addf %35, %37 : vector<14x128xf32>
    %cst_37 = arith.constant 0.000000e+00 : f32
    %39 = vector.broadcast %cst_37 : f32 to vector<14x128xf32>
    %40 = arith.maximumf %38, %39 : vector<14x128xf32>
    %41 = vector.extract_strided_slice %40 {offsets = [0, 0], sizes = [10, 128], strides = [1, 1]} : vector<14x128xf32> to vector<10x128xf32>
    %c0_38 = arith.constant 0 : index
    %c0_39 = arith.constant 0 : index
    %c0_40 = arith.constant 0 : index
    %42 = vector.load %arg4[%c0_38, %c0_39, %c0_40] : memref<5x128x256xf32, #tpu.memory_space<vmem>>, vector<1x128x256xf32>
    %43 = vector.shape_cast %42 : vector<1x128x256xf32> to vector<128x256xf32>
    %cst_41 = arith.constant dense<0.000000e+00> : vector<10x256xf32>
    %44 = tpu.matmul %41, %43, %cst_41 {dimension_numbers = #tpu.dot_dimension_numbers<[1], [0], [0], [1], [0, 0, 1, 1], [], []>} : vector<10x128xf32>, vector<128x256xf32>, vector<10x256xf32> -> vector<10x256xf32>
    %45 = vector.extract_strided_slice %40 {offsets = [1, 0], sizes = [10, 128], strides = [1, 1]} : vector<14x128xf32> to vector<10x128xf32>
    %c1_42 = arith.constant 1 : index
    %c0_43 = arith.constant 0 : index
    %c0_44 = arith.constant 0 : index
    %46 = vector.load %arg4[%c1_42, %c0_43, %c0_44] : memref<5x128x256xf32, #tpu.memory_space<vmem>>, vector<1x128x256xf32>
    %47 = vector.shape_cast %46 : vector<1x128x256xf32> to vector<128x256xf32>
    %cst_45 = arith.constant dense<0.000000e+00> : vector<10x256xf32>
    %48 = tpu.matmul %45, %47, %cst_45 {dimension_numbers = #tpu.dot_dimension_numbers<[1], [0], [0], [1], [0, 0, 1, 1], [], []>} : vector<10x128xf32>, vector<128x256xf32>, vector<10x256xf32> -> vector<10x256xf32>
    %49 = arith.addf %44, %48 : vector<10x256xf32>
    %50 = vector.extract_strided_slice %40 {offsets = [2, 0], sizes = [10, 128], strides = [1, 1]} : vector<14x128xf32> to vector<10x128xf32>
    %c2_46 = arith.constant 2 : index
    %c0_47 = arith.constant 0 : index
    %c0_48 = arith.constant 0 : index
    %51 = vector.load %arg4[%c2_46, %c0_47, %c0_48] : memref<5x128x256xf32, #tpu.memory_space<vmem>>, vector<1x128x256xf32>
    %52 = vector.shape_cast %51 : vector<1x128x256xf32> to vector<128x256xf32>
    %cst_49 = arith.constant dense<0.000000e+00> : vector<10x256xf32>
    %53 = tpu.matmul %50, %52, %cst_49 {dimension_numbers = #tpu.dot_dimension_numbers<[1], [0], [0], [1], [0, 0, 1, 1], [], []>} : vector<10x128xf32>, vector<128x256xf32>, vector<10x256xf32> -> vector<10x256xf32>
    %54 = arith.addf %49, %53 : vector<10x256xf32>
    %55 = vector.extract_strided_slice %40 {offsets = [3, 0], sizes = [10, 128], strides = [1, 1]} : vector<14x128xf32> to vector<10x128xf32>
    %c3_50 = arith.constant 3 : index
    %c0_51 = arith.constant 0 : index
    %c0_52 = arith.constant 0 : index
    %56 = vector.load %arg4[%c3_50, %c0_51, %c0_52] : memref<5x128x256xf32, #tpu.memory_space<vmem>>, vector<1x128x256xf32>
    %57 = vector.shape_cast %56 : vector<1x128x256xf32> to vector<128x256xf32>
    %cst_53 = arith.constant dense<0.000000e+00> : vector<10x256xf32>
    %58 = tpu.matmul %55, %57, %cst_53 {dimension_numbers = #tpu.dot_dimension_numbers<[1], [0], [0], [1], [0, 0, 1, 1], [], []>} : vector<10x128xf32>, vector<128x256xf32>, vector<10x256xf32> -> vector<10x256xf32>
    %59 = arith.addf %54, %58 : vector<10x256xf32>
    %60 = vector.extract_strided_slice %40 {offsets = [4, 0], sizes = [10, 128], strides = [1, 1]} : vector<14x128xf32> to vector<10x128xf32>
    %c4_54 = arith.constant 4 : index
    %c0_55 = arith.constant 0 : index
    %c0_56 = arith.constant 0 : index
    %61 = vector.load %arg4[%c4_54, %c0_55, %c0_56] : memref<5x128x256xf32, #tpu.memory_space<vmem>>, vector<1x128x256xf32>
    %62 = vector.shape_cast %61 : vector<1x128x256xf32> to vector<128x256xf32>
    %cst_57 = arith.constant dense<0.000000e+00> : vector<10x256xf32>
    %63 = tpu.matmul %60, %62, %cst_57 {dimension_numbers = #tpu.dot_dimension_numbers<[1], [0], [0], [1], [0, 0, 1, 1], [], []>} : vector<10x128xf32>, vector<128x256xf32>, vector<10x256xf32> -> vector<10x256xf32>
    %64 = arith.addf %59, %63 : vector<10x256xf32>
    %65 = vector.extract_strided_slice %64 {offsets = [0, 0], sizes = [10, 128], strides = [1, 1]} : vector<10x256xf32> to vector<10x128xf32>
    %66 = vector.extract_strided_slice %64 {offsets = [0, 128], sizes = [10, 128], strides = [1, 1]} : vector<10x256xf32> to vector<10x128xf32>
    %67 = arith.maximumf %65, %66 : vector<10x128xf32>
    %c0_58 = arith.constant 0 : index
    %c0_59 = arith.constant 0 : index
    %68 = vector.load %arg14[%c0_58, %c0_59] : memref<10x128xf32, #tpu.memory_space<vmem>>, vector<10x128xf32>
    tpu.vector_store %arg14[%c0_58, %c0_59], %67 {strides = array<i32>} : memref<10x128xf32, #tpu.memory_space<vmem>>, vector<10x128xf32>,
    %c0_60 = arith.constant 0 : index
    %c0_61 = arith.constant 0 : index
    %69 = tpu.strided_load %arg14[%c0_60, %c0_61] {strides = array<i32: 2, 1>} : memref<10x128xf32, #tpu.memory_space<vmem>>, vector<5x128xf32>
    %c1_62 = arith.constant 1 : index
    %c0_63 = arith.constant 0 : index
    %70 = tpu.strided_load %arg14[%c1_62, %c0_63] {strides = array<i32: 2, 1>} : memref<10x128xf32, #tpu.memory_space<vmem>>, vector<5x128xf32>
    %71 = arith.maximumf %69, %70 : vector<5x128xf32>
    %c0_64 = arith.constant 0 : index
    %c0_65 = arith.constant 0 : index
    %72 = vector.load %arg5[%c0_64, %c0_65] : memref<1x128xf32, #tpu.memory_space<vmem>>, vector<1x128xf32>
    %73 = vector.broadcast %72 : vector<1x128xf32> to vector<5x128xf32>
    %74 = arith.addf %71, %73 : vector<5x128xf32>
    %cst_66 = arith.constant 0.000000e+00 : f32
    %75 = vector.broadcast %cst_66 : f32 to vector<5x128xf32>
    %76 = arith.maximumf %74, %75 : vector<5x128xf32>
    %c0_67 = arith.constant 0 : index
    %c0_68 = arith.constant 0 : index
    %77 = vector.load %arg15[%c0_67, %c0_68] : memref<5x128xf32, #tpu.memory_space<vmem>>, vector<5x128xf32>
    tpu.vector_store %arg15[%c0_67, %c0_68], %76 {strides = array<i32>} : memref<5x128xf32, #tpu.memory_space<vmem>>, vector<5x128xf32>,
    %c0_69 = arith.constant 0 : index
    %c0_70 = arith.constant 0 : index
    %78 = tpu.strided_load %arg15[%c0_69, %c0_70] {strides = array<i32: 5, 1>} : memref<5x128xf32, #tpu.memory_space<vmem>>, vector<1x128xf32>
    %c0_71 = arith.constant 0 : index
    %c0_72 = arith.constant 0 : index
    %c0_73 = arith.constant 0 : index
    %79 = vector.load %arg6[%c0_71, %c0_72, %c0_73] : memref<5x128x120xf32, #tpu.memory_space<vmem>>, vector<1x128x120xf32>
    %80 = vector.shape_cast %79 : vector<1x128x120xf32> to vector<128x120xf32>
    %cst_74 = arith.constant dense<0.000000e+00> : vector<1x120xf32>
    %81 = tpu.matmul %78, %80, %cst_74 {dimension_numbers = #tpu.dot_dimension_numbers<[1], [0], [0], [1], [0, 0, 1, 1], [], []>} : vector<1x128xf32>, vector<128x120xf32>, vector<1x120xf32> -> vector<1x120xf32>
    %c1_75 = arith.constant 1 : index
    %c0_76 = arith.constant 0 : index
    %82 = tpu.strided_load %arg15[%c1_75, %c0_76] {strides = array<i32: 5, 1>} : memref<5x128xf32, #tpu.memory_space<vmem>>, vector<1x128xf32>
    %c1_77 = arith.constant 1 : index
    %c0_78 = arith.constant 0 : index
    %c0_79 = arith.constant 0 : index
    %83 = vector.load %arg6[%c1_77, %c0_78, %c0_79] : memref<5x128x120xf32, #tpu.memory_space<vmem>>, vector<1x128x120xf32>
    %84 = vector.shape_cast %83 : vector<1x128x120xf32> to vector<128x120xf32>
    %cst_80 = arith.constant dense<0.000000e+00> : vector<1x120xf32>
    %85 = tpu.matmul %82, %84, %cst_80 {dimension_numbers = #tpu.dot_dimension_numbers<[1], [0], [0], [1], [0, 0, 1, 1], [], []>} : vector<1x128xf32>, vector<128x120xf32>, vector<1x120xf32> -> vector<1x120xf32>
    %86 = arith.addf %81, %85 : vector<1x120xf32>
    %c2_81 = arith.constant 2 : index
    %c0_82 = arith.constant 0 : index
    %87 = tpu.strided_load %arg15[%c2_81, %c0_82] {strides = array<i32: 5, 1>} : memref<5x128xf32, #tpu.memory_space<vmem>>, vector<1x128xf32>
    %c2_83 = arith.constant 2 : index
    %c0_84 = arith.constant 0 : index
    %c0_85 = arith.constant 0 : index
    %88 = vector.load %arg6[%c2_83, %c0_84, %c0_85] : memref<5x128x120xf32, #tpu.memory_space<vmem>>, vector<1x128x120xf32>
    %89 = vector.shape_cast %88 : vector<1x128x120xf32> to vector<128x120xf32>
    %cst_86 = arith.constant dense<0.000000e+00> : vector<1x120xf32>
    %90 = tpu.matmul %87, %89, %cst_86 {dimension_numbers = #tpu.dot_dimension_numbers<[1], [0], [0], [1], [0, 0, 1, 1], [], []>} : vector<1x128xf32>, vector<128x120xf32>, vector<1x120xf32> -> vector<1x120xf32>
    %91 = arith.addf %86, %90 : vector<1x120xf32>
    %c3_87 = arith.constant 3 : index
    %c0_88 = arith.constant 0 : index
    %92 = tpu.strided_load %arg15[%c3_87, %c0_88] {strides = array<i32: 5, 1>} : memref<5x128xf32, #tpu.memory_space<vmem>>, vector<1x128xf32>
    %c3_89 = arith.constant 3 : index
    %c0_90 = arith.constant 0 : index
    %c0_91 = arith.constant 0 : index
    %93 = vector.load %arg6[%c3_89, %c0_90, %c0_91] : memref<5x128x120xf32, #tpu.memory_space<vmem>>, vector<1x128x120xf32>
    %94 = vector.shape_cast %93 : vector<1x128x120xf32> to vector<128x120xf32>
    %cst_92 = arith.constant dense<0.000000e+00> : vector<1x120xf32>
    %95 = tpu.matmul %92, %94, %cst_92 {dimension_numbers = #tpu.dot_dimension_numbers<[1], [0], [0], [1], [0, 0, 1, 1], [], []>} : vector<1x128xf32>, vector<128x120xf32>, vector<1x120xf32> -> vector<1x120xf32>
    %96 = arith.addf %91, %95 : vector<1x120xf32>
    %c4_93 = arith.constant 4 : index
    %c0_94 = arith.constant 0 : index
    %97 = tpu.strided_load %arg15[%c4_93, %c0_94] {strides = array<i32: 5, 1>} : memref<5x128xf32, #tpu.memory_space<vmem>>, vector<1x128xf32>
    %c4_95 = arith.constant 4 : index
    %c0_96 = arith.constant 0 : index
    %c0_97 = arith.constant 0 : index
    %98 = vector.load %arg6[%c4_95, %c0_96, %c0_97] : memref<5x128x120xf32, #tpu.memory_space<vmem>>, vector<1x128x120xf32>
    %99 = vector.shape_cast %98 : vector<1x128x120xf32> to vector<128x120xf32>
    %cst_98 = arith.constant dense<0.000000e+00> : vector<1x120xf32>
    %100 = tpu.matmul %97, %99, %cst_98 {dimension_numbers = #tpu.dot_dimension_numbers<[1], [0], [0], [1], [0, 0, 1, 1], [], []>} : vector<1x128xf32>, vector<128x120xf32>, vector<1x120xf32> -> vector<1x120xf32>
    %101 = arith.addf %96, %100 : vector<1x120xf32>
    %c0_99 = arith.constant 0 : index
    %c0_100 = arith.constant 0 : index
    %102 = vector.load %arg7[%c0_99, %c0_100] : memref<1x120xf32, #tpu.memory_space<vmem>>, vector<1x120xf32>
    %103 = arith.addf %101, %102 : vector<1x120xf32>
    %cst_101 = arith.constant 0.000000e+00 : f32
    %104 = vector.broadcast %cst_101 : f32 to vector<1x120xf32>
    %105 = arith.maximumf %103, %104 : vector<1x120xf32>
    %c0_102 = arith.constant 0 : index
    %c0_103 = arith.constant 0 : index
    %106 = vector.load %arg8[%c0_102, %c0_103] : memref<120x84xf32, #tpu.memory_space<vmem>>, vector<120x84xf32>
    %cst_104 = arith.constant dense<0.000000e+00> : vector<1x84xf32>
    %107 = tpu.matmul %105, %106, %cst_104 {dimension_numbers = #tpu.dot_dimension_numbers<[1], [0], [0], [1], [0, 0, 1, 1], [], []>} : vector<1x120xf32>, vector<120x84xf32>, vector<1x84xf32> -> vector<1x84xf32>
    %c0_105 = arith.constant 0 : index
    %c0_106 = arith.constant 0 : index
    %108 = vector.load %arg9[%c0_105, %c0_106] : memref<1x84xf32, #tpu.memory_space<vmem>>, vector<1x84xf32>
    %109 = arith.addf %107, %108 : vector<1x84xf32>
    %cst_107 = arith.constant 0.000000e+00 : f32
    %110 = vector.broadcast %cst_107 : f32 to vector<1x84xf32>
    %111 = arith.maximumf %109, %110 : vector<1x84xf32>
    %c0_108 = arith.constant 0 : index
    %c0_109 = arith.constant 0 : index
    %112 = vector.load %arg10[%c0_108, %c0_109] : memref<84x10xf32, #tpu.memory_space<vmem>>, vector<84x10xf32>
    %cst_110 = arith.constant dense<0.000000e+00> : vector<1x10xf32>
    %113 = tpu.matmul %111, %112, %cst_110 {dimension_numbers = #tpu.dot_dimension_numbers<[1], [0], [0], [1], [0, 0, 1, 1], [], []>} : vector<1x84xf32>, vector<84x10xf32>, vector<1x10xf32> -> vector<1x10xf32>
    %c0_111 = arith.constant 0 : index
    %c0_112 = arith.constant 0 : index
    %114 = vector.load %arg11[%c0_111, %c0_112] : memref<1x10xf32, #tpu.memory_space<vmem>>, vector<1x10xf32>
    %115 = arith.addf %113, %114 : vector<1x10xf32>
    %c0_113 = arith.constant 0 : index
    %c0_114 = arith.constant 0 : index
    %c0_115 = arith.constant 0 : index
    %116 = vector.load %arg12[%c0_113, %c0_114, %c0_115] : memref<1x1x10xf32, #tpu.memory_space<vmem>>, vector<1x1x10xf32>
    %117 = vector.shape_cast %116 : vector<1x1x10xf32> to vector<1x10xf32>
    %118 = vector.shape_cast %115 : vector<1x10xf32> to vector<1x1x10xf32>
    tpu.vector_store %arg12[%c0_113, %c0_114, %c0_115], %118 {strides = array<i32>} : memref<1x1x10xf32, #tpu.memory_space<vmem>>, vector<1x1x10xf32>,
    return
  }
  func.func @transform_0(%arg0: i32) -> (i32, i32, i32) {
    %c0_i32 = arith.constant 0 : i32
    %c0_i32_0 = arith.constant 0 : i32
    %c0_i32_1 = arith.constant 0 : i32
    return %arg0, %c0_i32, %c0_i32_0 : i32, i32, i32
  }
  func.func @transform_1(%arg0: i32) -> (i32, i32, i32) {
    %c0_i32 = arith.constant 0 : i32
    %c0_i32_0 = arith.constant 0 : i32
    %c0_i32_1 = arith.constant 0 : i32
    %c0_i32_2 = arith.constant 0 : i32
    return %c0_i32, %c0_i32_0, %c0_i32_1 : i32, i32, i32
  }
  func.func @transform_2(%arg0: i32) -> (i32, i32) {
    %c0_i32 = arith.constant 0 : i32
    %c0_i32_0 = arith.constant 0 : i32
    %c0_i32_1 = arith.constant 0 : i32
    return %c0_i32, %c0_i32_0 : i32, i32
  }
  func.func @transform_3(%arg0: i32) -> (i32, i32, i32) {
    %c0_i32 = arith.constant 0 : i32
    %c0_i32_0 = arith.constant 0 : i32
    %c0_i32_1 = arith.constant 0 : i32
    %c0_i32_2 = arith.constant 0 : i32
    return %c0_i32, %c0_i32_0, %c0_i32_1 : i32, i32, i32
  }
  func.func @transform_4(%arg0: i32) -> (i32, i32) {
    %c0_i32 = arith.constant 0 : i32
    %c0_i32_0 = arith.constant 0 : i32
    %c0_i32_1 = arith.constant 0 : i32
    return %c0_i32, %c0_i32_0 : i32, i32
  }
  func.func @transform_5(%arg0: i32) -> (i32, i32, i32) {
    %c0_i32 = arith.constant 0 : i32
    %c0_i32_0 = arith.constant 0 : i32
    %c0_i32_1 = arith.constant 0 : i32
    %c0_i32_2 = arith.constant 0 : i32
    return %c0_i32, %c0_i32_0, %c0_i32_1 : i32, i32, i32
  }
  func.func @transform_6(%arg0: i32) -> (i32, i32) {
    %c0_i32 = arith.constant 0 : i32
    %c0_i32_0 = arith.constant 0 : i32
    %c0_i32_1 = arith.constant 0 : i32
    return %c0_i32, %c0_i32_0 : i32, i32
  }
  func.func @transform_7(%arg0: i32) -> (i32, i32) {
    %c0_i32 = arith.constant 0 : i32
    %c0_i32_0 = arith.constant 0 : i32
    %c0_i32_1 = arith.constant 0 : i32
    return %c0_i32, %c0_i32_0 : i32, i32
  }
  func.func @transform_8(%arg0: i32) -> (i32, i32) {
    %c0_i32 = arith.constant 0 : i32
    %c0_i32_0 = arith.constant 0 : i32
    %c0_i32_1 = arith.constant 0 : i32
    return %c0_i32, %c0_i32_0 : i32, i32
  }
  func.func @transform_9(%arg0: i32) -> (i32, i32) {
    %c0_i32 = arith.constant 0 : i32
    %c0_i32_0 = arith.constant 0 : i32
    %c0_i32_1 = arith.constant 0 : i32
    return %c0_i32, %c0_i32_0 : i32, i32
  }
  func.func @transform_10(%arg0: i32) -> (i32, i32) {
    %c0_i32 = arith.constant 0 : i32
    %c0_i32_0 = arith.constant 0 : i32
    %c0_i32_1 = arith.constant 0 : i32
    return %c0_i32, %c0_i32_0 : i32, i32
  }
  func.func @transform_11(%arg0: i32) -> (i32, i32, i32) {
    %c0_i32 = arith.constant 0 : i32
    %c0_i32_0 = arith.constant 0 : i32
    %c0_i32_1 = arith.constant 0 : i32
    return %arg0, %c0_i32, %c0_i32_0 : i32, i32, i32
  }
}

</mosaic_0001>

<bundles_post_ra>
// kernel: tile.19
= control target key start
LH: loop header
LB: loop body
LE: loop exit
PB: predicated region body
PF: predicated region fallthrough
CT: control target
= control target key end

     0   :  { %s43_s10 = smov 64   ;;  %s44_s11 = smov 32   ;;  %vm3_vm0 = vcmask 130048   ;;  %vm9_vm1 = vcmask 654848   ;;  %vm15_vm2 = vcmask 523648   ;;  %vm21_vm3 = vcmask 392448   ;;  %s75_s0 = inlined_call_operand.vmem [shape: f32[5,16], index: 0, kind: input, shape index: {}]   ;;  %s76_s1 = inlined_call_operand.vmem [shape: f32[80], index: 1, kind: output, shape index: {}]  }
   0x1   :  { %v35_v0 = vld [vmem:[%s75_s0 + $0x4] sm:$0x1]   ;;  %v37_v1 = vld [vmem:[%s75_s0 + $0x2] sm:$0x1]   ;;  %v36_v2 = vld [vmem:[%s75_s0 + $0x3] sm:$0x1]  }
   0x2   :  { %7 = vrot.lane.b32.xlu0 %v35_v0, %s43_s10  ;;  %19 = vrot.lane.b32.xlu1 %v37_v1, %s44_s11  ;;  %v38_v3 = vld [vmem:[%s75_s0 + $0x1] sm:$0x1]   ;;  %v2_v4 = vld [vmem:[%s75_s0] sm:$0x1]   ;;  %s45_s0 = smov 48   ;;  %s46_s18 = smov 16  }
   0x3   :  { %4 = vst.msk [vmem:[#allocation0] sm:$0x1] %vm3_vm0, %v2_v4   ;;  %vm27_vm4 = vcmask 261248  }
   0x6   :  { %13 = vrot.lane.b32.xlu0 %v36_v2, %s45_s0  ;;  %25 = vrot.lane.b32.xlu1 %v38_v3, %s46_s18 }
  0x74   :  { %v8_v5 = vpop.permute.xlu0 %7   ;;  %v20_v6 = vpop.permute.xlu1 %19  }
  0x75   :  { %10 = vst.msk [vmem:[#allocation0] sm:$0x1] %vm9_vm1, %v8_v5  }
  0x78   :  { %v14_v7 = vpop.permute.xlu0 %13   ;;  %v26_v8 = vpop.permute.xlu1 %25  }
  0x79   :  { %16 = vst.msk [vmem:[#allocation0] sm:$0x1] %vm15_vm2, %v14_v7  }
  0x7a   :  { %22 = vst.msk [vmem:[#allocation0] sm:$0x1] %vm21_vm3, %v20_v6  }
  0x7b   :  { %28 = vst.msk [vmem:[#allocation0] sm:$0x1] %vm27_vm4, %v26_v8  }
  0x82   :  { %v32_v9 = vld [vmem:[#allocation0] sm:$0x1] }
  0x83   :  { %34 = vst [vmem:[%s76_s1] sm:$0x1] %v32_v9 }

// kernel: tile.14
= control target key start
LH: loop header
LB: loop body
LE: loop exit
PB: predicated region body
PF: predicated region fallthrough
CT: control target
= control target key end

     0   :  { %s115_s10 = smov 78   ;;  %s116_s11 = smov 66   ;;  %vm3_vm0 = vcmask 48128   ;;  %vm9_vm1 = vcmask 687728   ;;  %vm15_vm2 = vcmask 638528   ;;  %vm21_vm3 = vcmask 589328   ;;  %s183_s0 = inlined_call_operand.vmem [shape: f32[14,6], index: 0, kind: input, shape index: {}]   ;;  %s184_s1 = inlined_call_operand.vmem [shape: f32[84], index: 1, kind: output, shape index: {}]  }
   0x1   :  { %v89_v0 = vld [vmem:[%s183_s0 + $0xd] sm:$0x1]   ;;  %v91_v1 = vld [vmem:[%s183_s0 + $0xb] sm:$0x1]   ;;  %v90_v2 = vld [vmem:[%s183_s0 + $0xc] sm:$0x1]  }
   0x2   :  { %7 = vrot.lane.b32.xlu0 %v89_v0, %s115_s10  ;;  %19 = vrot.lane.b32.xlu1 %v91_v1, %s116_s11  ;;  %v92_v3 = vld [vmem:[%s183_s0 + $0xa] sm:$0x1]   ;;  %s117_s16 = smov 72   ;;  %s118_s17 = smov 60   ;;  %v93_v4 = vld [vmem:[%s183_s0 + $0x9] sm:$0x1]  }
   0x3   :  { %v94_v5 = vld [vmem:[%s183_s0 + $0x8] sm:$0x1]   ;;  %v2_v6 = vld [vmem:[%s183_s0] sm:$0x1]   ;;  %s119_s24 = smov 54   ;;  %s120_s25 = smov 48  }
   0x4   :  { %4 = vst.msk [vmem:[#allocation0] sm:$0x1] %vm3_vm0, %v2_v6   ;;  %v95_v7 = vld [vmem:[%s183_s0 + $0x7] sm:$0x1]   ;;  %v96_v8 = vld [vmem:[%s183_s0 + $0x6] sm:$0x1]  }
   0x5   :  { %s121_s30 = smov 42   ;;  %s122_s2 = smov 36   ;;  %v97_v9 = vld [vmem:[%s183_s0 + $0x5] sm:$0x1]   ;;  %v98_v10 = vld [vmem:[%s183_s0 + $0x4] sm:$0x1]  }
   0x6   :  { %13 = vrot.lane.b32.xlu0 %v90_v2, %s117_s16  ;;  %25 = vrot.lane.b32.xlu1 %v92_v3, %s118_s17  ;;  %s123_s7 = smov 30   ;;  %s124_s8 = smov 24   ;;  %v99_v11 = vld [vmem:[%s183_s0 + $0x3] sm:$0x1]   ;;  %v100_v12 = vld [vmem:[%s183_s0 + $0x2] sm:$0x1]  }
   0x7   :  { %s125_s13 = smov 18   ;;  %s126_s14 = smov 12   ;;  %v101_v13 = vld [vmem:[%s183_s0 + $0x1] sm:$0x1]   ;;  %vm27_vm4 = vcmask 540128   ;;  %vm33_vm5 = vcmask 490928  }
   0x8   :  { %s127_s0 = smov 6   ;;  %vm39_vm6 = vcmask 441728   ;;  %vm45_vm7 = vcmask 392528   ;;  %vm51_vm8 = vcmask 343328   ;;  %vm57_vm9 = vcmask 294128  }
   0x9   :  { %vm63_vm10 = vcmask 244928   ;;  %vm69_vm11 = vcmask 195728   ;;  %vm75_vm12 = vcmask 146528   ;;  %vm81_vm13 = vcmask 97328  }
   0xa   :  { %31 = vrot.lane.b32.xlu0 %v93_v4, %s119_s24  ;;  %37 = vrot.lane.b32.xlu1 %v94_v5, %s120_s25 }
   0xe   :  { %43 = vrot.lane.b32.xlu0 %v95_v7, %s121_s30  ;;  %49 = vrot.lane.b32.xlu1 %v96_v8, %s122_s2 }
  0x12   :  { %55 = vrot.lane.b32.xlu0 %v97_v9, %s123_s7  ;;  %61 = vrot.lane.b32.xlu1 %v98_v10, %s124_s8 }
  0x16   :  { %67 = vrot.lane.b32.xlu0 %v99_v11, %s125_s13  ;;  %73 = vrot.lane.b32.xlu1 %v100_v12, %s126_s14 }
  0x1a   :  { %79 = vrot.lane.b32.xlu0 %v101_v13, %s127_s0 }
  0x74   :  { %v8_v14 = vpop.permute.xlu0 %7   ;;  %v20_v15 = vpop.permute.xlu1 %19  }
  0x75   :  { %10 = vst.msk [vmem:[#allocation0] sm:$0x1] %vm9_vm1, %v8_v14  }
  0x78   :  { %v14_v16 = vpop.permute.xlu0 %13   ;;  %v26_v17 = vpop.permute.xlu1 %25  }
  0x79   :  { %16 = vst.msk [vmem:[#allocation0] sm:$0x1] %vm15_vm2, %v14_v16  }
  0x7a   :  { %22 = vst.msk [vmem:[#allocation0] sm:$0x1] %vm21_vm3, %v20_v15  }
  0x7b   :  { %28 = vst.msk [vmem:[#allocation0] sm:$0x1] %vm27_vm4, %v26_v17  }
  0x7c   :  { %v32_v18 = vpop.permute.xlu0 %31   ;;  %v38_v19 = vpop.permute.xlu1 %37  }
  0x7d   :  { %34 = vst.msk [vmem:[#allocation0] sm:$0x1] %vm33_vm5, %v32_v18  }
  0x7e   :  { %40 = vst.msk [vmem:[#allocation0] sm:$0x1] %vm39_vm6, %v38_v19  }
  0x80   :  { %v44_v20 = vpop.permute.xlu0 %43   ;;  %v50_v21 = vpop.permute.xlu1 %49  }
  0x81   :  { %46 = vst.msk [vmem:[#allocation0] sm:$0x1] %vm45_vm7, %v44_v20  }
  0x82   :  { %52 = vst.msk [vmem:[#allocation0] sm:$0x1] %vm51_vm8, %v50_v21  }
  0x84   :  { %v56_v22 = vpop.permute.xlu0 %55   ;;  %v62_v23 = vpop.permute.xlu1 %61  }
  0x85   :  { %58 = vst.msk [vmem:[#allocation0] sm:$0x1] %vm57_vm9, %v56_v22  }
  0x86   :  { %64 = vst.msk [vmem:[#allocation0] sm:$0x1] %vm63_vm10, %v62_v23  }
  0x88   :  { %v68_v24 = vpop.permute.xlu0 %67   ;;  %v74_v25 = vpop.permute.xlu1 %73  }
  0x89   :  { %70 = vst.msk [vmem:[#allocation0] sm:$0x1] %vm69_vm11, %v68_v24  }
  0x8a   :  { %76 = vst.msk [vmem:[#allocation0] sm:$0x1] %vm75_vm12, %v74_v25  }
  0x8c   :  { %v80_v26 = vpop.permute.xlu0 %79  }
  0x8d   :  { %82 = vst.msk [vmem:[#allocation0] sm:$0x1] %vm81_vm13, %v80_v26  }
  0x94   :  { %v86_v27 = vld [vmem:[#allocation0] sm:$0x1] }
  0x95   :  { %88 = vst [vmem:[%s184_s1] sm:$0x1] %v86_v27 }

// kernel: tile.18
= control target key start
LH: loop header
LB: loop body
LE: loop exit
PB: predicated region body
PF: predicated region fallthrough
CT: control target
= control target key end

     0   :  { %2 = vsyncpa [#allocation1], 0  ;;  %s44_s6 = smov [#allocation0]   ;;  %s70_s0 = inlined_call_operand.hbm [shape: f32[16], index: 0, kind: input, shape index: {}]   ;;  %s71_s1 = inlined_call_operand.vmem [shape: f32[5,16], index: 1, kind: output, shape index: {}]  }
   0x1   :  { %s9_s7 = sshll.u32 %s44_s6, 4  ;;  %s20_s10 = scalar_lea.hbm %s70_s0, 16  ;;  %s10_s7 = int_to_ptr.vmem [resolvable:$true] %s9_s7 }
   0x2   :  { %p21_p0 = scmp.ne.s32.totalorder %s70_s0, %s20_s10  ;;  %p24_p1 = scmp.lt.u32.totalorder %s20_s10, %s70_s0 }
   0x4   :  { %p26_p2 = pnand %p24_p1, %p21_p0 }
   0x6   :  { %29 = shalt.err (!%p26_p2)
}
   0x7   :  { %s30_s15 = scalar_lea.vmem %s10_s7, 16  ;;  %s34_s16 = scalar_lea.vmem %s10_s7, 32 }
   0x8   :  { %p31_p3 = scmp.ne.s32.totalorder %s10_s7, %s30_s15  ;;  %p35_p4 = scmp.lt.s32.totalorder %s10_s7, %s10_s7 }
   0x9   :  { %p36_p5 = scmp.lt.s32.totalorder %s34_s16, %s30_s15 }
   0xb   :  { %p37_p6 = por %p36_p5, %p35_p4 }
   0xd   :  { %p38_p7 = pnand %p37_p6, %p31_p3 }
   0xf   :  { %41 = shalt.err (!%p38_p7)
}
  0x10   :  { %12 = dma.hbm_to_vmem [thread:$0]  %s70_s0, 16, %s10_s7, [#allocation1]  }
  0x11   :  { %42 = dma.done.wait [#allocation1], 16  }
  0x12   :  { %43 = vsyncadd [#allocation1], 4294967280  ;;  %v16_v0 = vld [vmem:[#allocation0] ss:$0 sm:$0xff] }
  0x13   :  { %17 = vst [vmem:[%s71_s1] sm:$0xff] %v16_v0 }
  0x14   :  { %18 = vsyncpa [#allocation1], 1 }

// kernel: tile.13
= control target key start
LH: loop header
LB: loop body
LE: loop exit
PB: predicated region body
PF: predicated region fallthrough
CT: control target
= control target key end

     0   :  { %2 = vsyncpa [#allocation1], 0  ;;  %s47_s6 = smov [#allocation0]   ;;  %s76_s0 = inlined_call_operand.hbm [shape: f32[6], index: 0, kind: input, shape index: {}]   ;;  %s77_s1 = inlined_call_operand.vmem [shape: f32[14,6], index: 1, kind: output, shape index: {}]  }
   0x1   :  { %s9_s7 = sshll.u32 %s47_s6, 4  ;;  %s23_s10 = scalar_lea.hbm %s76_s0, 16  ;;  %s10_s7 = int_to_ptr.vmem [resolvable:$true] %s9_s7 }
   0x2   :  { %p24_p0 = scmp.ne.s32.totalorder %s76_s0, %s23_s10  ;;  %p27_p1 = scmp.lt.u32.totalorder %s23_s10, %s76_s0 }
   0x4   :  { %p29_p2 = pnand %p27_p1, %p24_p0 }
   0x6   :  { %32 = shalt.err (!%p29_p2)
}
   0x7   :  { %s33_s15 = scalar_lea.vmem %s10_s7, 16  ;;  %s37_s16 = scalar_lea.vmem %s10_s7, 32 }
   0x8   :  { %p34_p3 = scmp.ne.s32.totalorder %s10_s7, %s33_s15  ;;  %p38_p4 = scmp.lt.s32.totalorder %s10_s7, %s10_s7 }
   0x9   :  { %p39_p5 = scmp.lt.s32.totalorder %s37_s16, %s33_s15 }
   0xb   :  { %p40_p6 = por %p39_p5, %p38_p4 }
   0xd   :  { %p41_p7 = pnand %p40_p6, %p34_p3 }
   0xf   :  { %44 = shalt.err (!%p41_p7)
}
  0x10   :  { %12 = dma.hbm_to_vmem [thread:$0]  %s76_s0, 16, %s10_s7, [#allocation1]  }
  0x11   :  { %45 = dma.done.wait [#allocation1], 16  }
  0x12   :  { %46 = vsyncadd [#allocation1], 4294967280  ;;  %v16_v0 = vld [vmem:[#allocation0] ss:$0 sm:$0xff] }
  0x13   :  { %17 = vst [vmem:[%s77_s1] sm:$0xff] %v16_v0  ;;  %21 = vst [vmem:[%s77_s1 + $0x8] sm:$0xff] %v16_v0 }
  0x14   :  { %20 = vsyncpa [#allocation1], 1 }

// kernel: net_forward.1
= control target key start
LH: loop header
LB: loop body
LE: loop exit
PB: predicated region body
PF: predicated region fallthrough
CT: control target
= control target key end

     0   :  { %16 = vsyncpa [#allocation6], 0  ;;  %s5166_s0 = inlined_call_operand.vmem [shape: f32[2,32,96], index: 0, kind: input, shape index: {}]   ;;  %s5167_s1 = inlined_call_operand.vmem [shape: f32[5,96,256], index: 1, kind: input, shape index: {}]   ;;  %s5168_s2 = inlined_call_operand.vmem [shape: f32[1,128], index: 2, kind: input, shape index: {}]   ;;  %s5169_s3 = inlined_call_operand.vmem [shape: f32[5,128,256], index: 3, kind: input, shape index: {}]   ;;  %s5170_s4 = inlined_call_operand.vmem [shape: f32[1,128], index: 4, kind: input, shape index: {}]   ;;  %s5171_s5 = inlined_call_operand.vmem [shape: f32[5,128,120], index: 5, kind: input, shape index: {}]   ;;  %s5172_s6 = inlined_call_operand.vmem [shape: f32[1,120], index: 6, kind: input, shape index: {}]   ;;  %s5173_s7 = inlined_call_operand.vmem [shape: f32[120,84], index: 7, kind: input, shape index: {}]   ;;  %s5174_s8 = inlined_call_operand.vmem [shape: f32[1,84], index: 8, kind: input, shape index: {}]   ;;  %s5175_s9 = inlined_call_operand.vmem [shape: f32[84,10], index: 9, kind: input, shape index: {}]   ;;  %s5176_s10 = inlined_call_operand.vmem [shape: f32[1,10], index: 10, kind: input, shape index: {}]   ;;  %s5177_s11 = inlined_call_operand.hbm [shape: f32[2,1,10], index: 11, kind: output, shape index: {}]  }
   0x1   :  { %18 = vsyncpa [#allocation6 + $0x1], 0  ;;  %s3713_s17 = smov 0   ;;  %s3715_s18 = smov 0  }
   0x2   :  { %s3717_s19 = smov 0   ;;  %s3719_s20 = smov 0  }
   0x3 LB: > { %5179 = sst [smem:[#allocation8_spill]] %s3643_s19  ;;  %s3734_s21 = sadd.s32 4294967295, %s3647_s20   ;;  %s3647_s20 = sphi %s3719_s20, %s5187_s20   ;;  %s3643_s19 = sphi %s3717_s19, %s5184_s19   ;;  %s3639_s18 = sphi %s3715_s18, %s5186_s18   ;;  %s3635_s17 = sphi %s3713_s17, %s5185_s17  }
   0x4   : > { %s2390_s22 = sadd.s32 4294967294, %s3647_s20   ;;  %s3738_s23 = sadd.s32 1, %s3647_s20  }
   0x5   : > { %s267_s24 = sadd.s32 1, %s3643_s19  ;;  %s264_s25 = ssub.s32 %s3647_s20, %s3738_s23 }
   0x6   : > { %p277_p0 = scmp.ne.s32.totalorder %s3643_s19, %s3639_s18  ;;  %p265_p1 = scmp.eq.s32.totalorder %s264_s25, 0 }
   0x7   : > { %p278_p2 = scmp.eq.s32.totalorder %s3734_s21, 1  ;;  %p283_p3 = scmp.ne.s32.totalorder %s3639_s18, %s3635_s17 }
   0x8   : > { %p284_p4 = scmp.eq.s32.totalorder %s2390_s22, 1  ;;  %p2393_p7 = scmp.ge.s32.totalorder %s3647_s20, 1 }
   0x9   : > { %s3749_s26 = scalar_select %p265_p1, %s3643_s19, %s267_s24  }
   0xa   : > { %p3751_p5 = por %p278_p2, %p277_p0  ;;  %p3755_p6 = por %p284_p4, %p283_p3 }
   0xb   : > { %5180 = sst [smem:[#allocation9_spill]] %s3749_s26  ;;  %p340_p8 = scmp.lt.s32.totalorder %s3647_s20, 3 }
   0xd   : > { %p341_p9 = pnand %p2393_p7, %p340_p8 }
   0xe   : > { %v2397_v0 = vld [vmem:[%s5167_s1 + $0xc8] sm:$0xff] (!%p341_p9)  ;;  %v2399_v1 = vld [vmem:[%s5167_s1 + $0xd8] sm:$0xff] (!%p341_p9)  ;;  %v2396_v2 = vld [vmem:[%s5167_s1 + $0xc0] sm:$0xff] (!%p341_p9)  ;;  %v3649_v7 = vmov (!%p341_p9), 0.0   ;;  %p379_p10 = scmp.lt.s32.totalorder (!%p341_p9), %s3734_s21, 1  ;;  %vm441_vm0 = vcmask (!%p341_p9), 785408  }
   0xf   : > { %344 = sbr.rel (%p341_p9) target bundleno = 1478 (0x5c6), region = 64  ;;  %v3059_v3 = vpack.c.bf16 (!%p341_p9), %v2399_v1, %v2397_v0  ;;  %v2398_v4 = vld [vmem:[%s5167_s1 + $0xd0] sm:$0xff] (!%p341_p9)  ;;  %v2401_v5 = vld [vmem:[%s5167_s1 + $0xe8] sm:$0xff] (!%p341_p9)  ;;  %v2403_v6 = vld [vmem:[%s5167_s1 + $0xf8] sm:$0xff] (!%p341_p9)  ;;  %518 = vmatprep.mubr.f32.mxu0 (!%p341_p9), %v3649_v7  ;;  %1223 = vmatprep.mubr.f32.mxu1 (!%p341_p9), %v3649_v7  ;;  %vm1153_vm1 = vcmask (!%p341_p9), 1046528   ;;  %vm1346_vm2 = vcmask (!%p341_p9), 1045504  }
  0x10   : > { %v3061_v8 = vpack.c.bf16 (!%p341_p9), %v2398_v4, %v2396_v2  ;;  %v3063_v9 = vpack.c.bf16 (!%p341_p9), %v2403_v6, %v2401_v5  ;;  %v2400_v10 = vld [vmem:[%s5167_s1 + $0xe0] sm:$0xff] (!%p341_p9)  ;;  %v2402_v11 = vld [vmem:[%s5167_s1 + $0xf0] sm:$0xff] (!%p341_p9)  ;;  %v2405_v12 = vld [vmem:[%s5167_s1 + $0x108] sm:$0xff] (!%p341_p9)  ;;  %vm1466_vm3 = vcmask (!%p341_p9), 1044480   ;;  %vm1586_vm4 = vcmask (!%p341_p9), 1043456   ;;  %s377_s14 = sand.u32 (!%p341_p9), 1, %s3639_s18  }
  0x11   : > { %3060 = vmatprep.subr.bf16.mxu0 (!%p341_p9), %v3059_v3  ;;  %v2407_v13 = vld [vmem:[%s5167_s1 + $0x118] sm:$0xff] (!%p341_p9)  ;;  %v3065_v14 = vpack.c.bf16 (!%p341_p9), %v2402_v11, %v2400_v10  ;;  %v2404_v16 = vld [vmem:[%s5167_s1 + $0x100] sm:$0xff] (!%p341_p9)  ;;  %v2406_v17 = vld [vmem:[%s5167_s1 + $0x110] sm:$0xff] (!%p341_p9)  ;;  %vm3651_vm5 = vmmov (!%p341_p9), 0   ;;  %vm2156_vm6 = vcmask (!%p341_p9), 982016   ;;  %vm2243_vm7 = vcmask (!%p341_p9), 687104  }
  0x12   : > { %3062 = vmatpush1.bf16.msra.mxu0 (!%p341_p9), %v3061_v8  ;;  %v3067_v15 = vpack.c.bf16 (!%p341_p9), %v2407_v13, %v2405_v12  ;;  %v2409_v18 = vld [vmem:[%s5167_s1 + $0x128] sm:$0xff] (!%p341_p9)  ;;  %v2411_v19 = vld [vmem:[%s5167_s1 + $0x138] sm:$0xff] (!%p341_p9)  ;;  %v3069_v20 = vpack.c.bf16 (!%p341_p9), %v2406_v17, %v2404_v16  ;;  %v2408_v22 = vld [vmem:[%s5167_s1 + $0x120] sm:$0xff] (!%p341_p9)  ;;  %s2709_s16 = sshll.u32 (!%p341_p9), %s3734_s21, 4  ;;  %s378_s26 = scalar_lea.vmem (!%p341_p9), [#allocation5], %s377_s14  ;;  %vm2320_vm8 = vcmask (!%p341_p9), 73728  }
  0x13   : > { %3064 = vmatprep.subr.bf16.mxu0 (!%p341_p9), %v3063_v9  ;;  %v3071_v21 = vpack.c.bf16 (!%p341_p9), %v2411_v19, %v2409_v18  ;;  %v2410_v23 = vld [vmem:[%s5167_s1 + $0x130] sm:$0xff] (!%p341_p9)  ;;  %v2413_v24 = vld [vmem:[%s5167_s1 + $0x148] sm:$0xff] (!%p341_p9)  ;;  %v2415_v25 = vld [vmem:[%s5167_s1 + $0x158] sm:$0xff] (!%p341_p9)  ;;  %s2323_s25 = scalar_lea.sflag (!%p341_p9), [#allocation6], %s377_s14 }
  0x14   : > { %v3073_v26 = vpack.c.bf16 (!%p341_p9), %v2410_v23, %v2408_v22  ;;  %v3075_v27 = vpack.c.bf16 (!%p341_p9), %v2415_v25, %v2413_v24  ;;  %v2412_v28 = vld [vmem:[%s5167_s1 + $0x140] sm:$0xff] (!%p341_p9)  ;;  %v2414_v29 = vld [vmem:[%s5167_s1 + $0x150] sm:$0xff] (!%p341_p9)  ;;  %v2417_v30 = vld [vmem:[%s5167_s1 + $0x168] sm:$0xff] (!%p341_p9) }
  0x15   : > { %v2419_v31 = vld [vmem:[%s5167_s1 + $0x178] sm:$0xff] (!%p341_p9)  ;;  %v3077_v32 = vpack.c.bf16 (!%p341_p9), %v2414_v29, %v2412_v28  ;;  %v2416_v34 = vld [vmem:[%s5167_s1 + $0x160] sm:$0xff] (!%p341_p9)  ;;  %v2418_v35 = vld [vmem:[%s5167_s1 + $0x170] sm:$0xff] (!%p341_p9) }
  0x16   : > { %3066 = vmatpush1.bf16.msra.mxu0 %v3065_v14  ;;  %s380_s29 = scalar_select %p379_p10, %s3734_s21, 1  ;;  %v3079_v33 = vpack.c.bf16 %v2419_v31, %v2417_v30  ;;  %v389_v36 = vld [vmem:[%s5167_s1 + $0x8] sm:$0xff]  ;;  %v391_v37 = vld [vmem:[%s5167_s1 + $0x18] sm:$0xff]  ;;  %v3081_v38 = vpack.c.bf16 %v2418_v35, %v2416_v34  ;;  %v388_v40 = vld [vmem:[%s5167_s1] sm:$0xff] }
  0x17   : > { %3068 = vmatprep.subr.bf16.mxu0 %v3067_v15  ;;  %v3083_v39 = vpack.c.bf16 %v391_v37, %v389_v36  ;;  %v390_v41 = vld [vmem:[%s5167_s1 + $0x10] sm:$0xff]  ;;  %v393_v42 = vld [vmem:[%s5167_s1 + $0x28] sm:$0xff]  ;;  %v395_v43 = vld [vmem:[%s5167_s1 + $0x38] sm:$0xff]  ;;  %s3652_s21 = smov [#allocation5]  }
  0x18   : > { %s2712_s24 = sshll.u32 %s380_s29, 5  ;;  %v3085_v45 = vpack.c.bf16 %v390_v41, %v388_v40  ;;  %v3087_v46 = vpack.c.bf16 %v395_v43, %v393_v42  ;;  %v392_v47 = vld [vmem:[%s5167_s1 + $0x20] sm:$0xff]  ;;  %v394_v48 = vld [vmem:[%s5167_s1 + $0x30] sm:$0xff]  ;;  %v397_v49 = vld [vmem:[%s5167_s1 + $0x48] sm:$0xff]  ;;  %s2335_s29 = sshll.u32 %s378_s26, 4  ;;  %s5126_s29 = int_to_ptr.vmem [resolvable:$true] %s2335_s29 }
  0x19   : > { %s3846_s12 = scalar_lea.vmem %s5166_s0, %s2712_s24  ;;  %v399_v50 = vld [vmem:[%s5167_s1 + $0x58] sm:$0xff]  ;;  %v3089_v51 = vpack.c.bf16 %v394_v48, %v392_v47  ;;  %v396_v54 = vld [vmem:[%s5167_s1 + $0x40] sm:$0xff]  ;;  %v398_v55 = vld [vmem:[%s5167_s1 + $0x50] sm:$0xff]  ;;  %s3585_s30 = scalar_lea.vmem %s5126_s29, 16 }
  0x1a   : > { %3070 = vmatpush1.bf16.msra.mxu0 %v3069_v20  ;;  %v412_v44 = vld [vmem:[%s3846_s12 + $0x1] sm:$0xff]  ;;  %v413_v52 = vld [vmem:[%s3846_s12 + $0x9] sm:$0xff]  ;;  %v3091_v53 = vpack.c.bf16 %v399_v50, %v397_v49  ;;  %v403_v57 = vld [vmem:[%s5167_s1 + $0x78] sm:$0xff]  ;;  %v3093_v58 = vpack.c.bf16 %v398_v55, %v396_v54  ;;  %p3586_p11 = scmp.ne.s32.totalorder %s5126_s29, %s3585_s30  ;;  %s3589_s13 = sshll.u32 %s3652_s21, 4  ;;  %s3590_s13 = int_to_ptr.vmem [resolvable:$false] %s3589_s13 }
  0x1b   : > { %3072 = vmatprep.subr.bf16.mxu0 %v3071_v21  ;;  %v401_v56 = vld [vmem:[%s5167_s1 + $0x68] sm:$0xff]  ;;  %v414_v59 = vld [vmem:[%s3846_s12 + $0x11] sm:$0xff]  ;;  %v400_v61 = vld [vmem:[%s5167_s1 + $0x60] sm:$0xff]  ;;  %s3591_s15 = scalar_lea.vmem %s3590_s13, 32  ;;  %p3592_p0 = scmp.lt.s32.totalorder %s5126_s29, %s3590_s13 }
  0x1c   : > { %v3095_v60 = vpack.c.bf16 %v403_v57, %v401_v56  ;;  %v402_v62 = vld [vmem:[%s5167_s1 + $0x70] sm:$0xff]  ;;  %v405_v63 = vld [vmem:[%s5167_s1 + $0x88] sm:$0xff]  ;;  %v407_v0 = vld [vmem:[%s5167_s1 + $0x98] sm:$0xff]  ;;  %p3587_p12 = pnand %p3586_p11, %p3751_p5  ;;  %p3593_p1 = scmp.lt.s32.totalorder %s3591_s15, %s3585_s30 }
  0x1d   : > { %v3097_v1 = vpack.c.bf16 %v402_v62, %v400_v61  ;;  %v415_v2 = vld [vmem:[%s3846_s12 + $0x19] sm:$0xf]  ;;  %v3099_v3 = vpack.c.bf16 %v407_v0, %v405_v63  ;;  %v404_v4 = vld [vmem:[%s5167_s1 + $0x80] sm:$0xff]  ;;  %v406_v5 = vld [vmem:[%s5167_s1 + $0x90] sm:$0xff] }
  0x1e   : > { %3074 = vmatpush1.bf16.msra.mxu0 %v3073_v26  ;;  %v409_v6 = vld [vmem:[%s5167_s1 + $0xa8] sm:$0xff]  ;;  %v411_v8 = vld [vmem:[%s5167_s1 + $0xb8] sm:$0xff]  ;;  %v3101_v9 = vpack.c.bf16 %v406_v5, %v404_v4  ;;  %v408_v11 = vld [vmem:[%s5167_s1 + $0xa0] sm:$0xff]  ;;  %p3588_p13 = pneg %p3587_p12  ;;  %p3594_p2 = por %p3593_p1, %p3592_p0 }
  0x1f   : > { %3076 = vmatprep.subr.bf16.mxu0 %v3075_v27  ;;  %v3103_v10 = vpack.c.bf16 %v411_v8, %v409_v6  ;;  %v410_v12 = vld [vmem:[%s5167_s1 + $0xb0] sm:$0xff]  ;;  %v2429_v13 = vld [vmem:[%s5167_s1 + $0x188] sm:$0xff]  ;;  %v2431_v14 = vld [vmem:[%s5167_s1 + $0x198] sm:$0xff] }
  0x20   : > { %v3105_v15 = vpack.c.bf16 %v410_v12, %v408_v11  ;;  %v3107_v16 = vpack.c.bf16 %v2431_v14, %v2429_v13  ;;  %v2428_v17 = vld [vmem:[%s5167_s1 + $0x180] sm:$0xff]  ;;  %v2430_v18 = vld [vmem:[%s5167_s1 + $0x190] sm:$0xff]  ;;  %v2433_v19 = vld [vmem:[%s5167_s1 + $0x1a8] sm:$0xff]  ;;  %p3595_p3 = pnand %p3594_p2, %p3588_p13 }
  0x21   : > { %v2435_v20 = vld [vmem:[%s5167_s1 + $0x1b8] sm:$0xff]  ;;  %v384_v21 = vld [vmem:[%s3846_s12] sm:$0xff]  ;;  %v3109_v22 = vpack.c.bf16 %v2430_v18, %v2428_v17  ;;  %v2434_v25 = vld [vmem:[%s5167_s1 + $0x1b0] sm:$0xff] }
  0x22   : > { %3078 = vmatpush1.bf16.msra.mxu0 %v3077_v32  ;;  %v3111_v23 = vpack.c.bf16 %v2435_v20, %v2433_v19  ;;  %v2432_v24 = vld [vmem:[%s5167_s1 + $0x1a0] sm:$0xff]  ;;  %v2437_v26 = vld [vmem:[%s5167_s1 + $0x1c8] sm:$0xff]  ;;  %v2439_v27 = vld [vmem:[%s5167_s1 + $0x1d8] sm:$0xff] }
  0x23   : > { %3080 = vmatprep.subr.bf16.mxu0 %v3079_v33  ;;  %v3113_v28 = vpack.c.bf16 %v2434_v25, %v2432_v24  ;;  %v385_v29 = vld [vmem:[%s3846_s12 + $0x8] sm:$0xff]  ;;  %v3115_v30 = vpack.c.bf16 %v2439_v27, %v2437_v26  ;;  %v2436_v31 = vld [vmem:[%s5167_s1 + $0x1c0] sm:$0xff]  ;;  %v2438_v32 = vld [vmem:[%s5167_s1 + $0x1d0] sm:$0xff] }
  0x24   : > { %v2441_v33 = vld [vmem:[%s5167_s1 + $0x1e8] sm:$0xff]  ;;  %v2443_v34 = vld [vmem:[%s5167_s1 + $0x1f8] sm:$0xff]  ;;  %v3117_v35 = vpack.c.bf16 %v2438_v32, %v2436_v31  ;;  %v386_v36 = vld [vmem:[%s3846_s12 + $0x10] sm:$0xff] }
  0x25   : > { %v3119_v37 = vpack.c.bf16 %v2443_v34, %v2441_v33  ;;  %v2445_v40 = vld [vmem:[%s5167_s1 + $0x208] sm:$0xff]  ;;  %v2447_v41 = vld [vmem:[%s5167_s1 + $0x218] sm:$0xff]  ;;  %v2456_v57 = vld [vmem:[%s5167_s1 + $0x240] sm:$0xff] }
  0x26   : > { %3082 = vmatpush1.bf16.msra.mxu0 %v3081_v38  ;;  %v2440_v38 = vld [vmem:[%s5167_s1 + $0x1e0] sm:$0xff]  ;;  %v387_v43 = vld [vmem:[%s3846_s12 + $0x18] sm:$0xf]  ;;  %v2449_v47 = vld [vmem:[%s5167_s1 + $0x228] sm:$0xff] }
  0x27   : > { %3084 = vmatprep.subr.bf16.mxu0 %v3083_v39  ;;  %v2442_v39 = vld [vmem:[%s5167_s1 + $0x1f0] sm:$0xff]  ;;  %v2451_v48 = vld [vmem:[%s5167_s1 + $0x238] sm:$0xff]  ;;  %v644_v61 = vld [vmem:[%s3846_s12 + $0x2] sm:$0xff] }
  0x28   : > { %v3121_v42 = vpack.c.bf16 %v2442_v39, %v2440_v38  ;;  %v3127_v50 = vpack.c.bf16 %v2451_v48, %v2449_v47  ;;  %v2459_v54 = vld [vmem:[%s5167_s1 + $0x258] sm:$0xff]  ;;  %v2460_v0 = vld [vmem:[%s5167_s1 + $0x260] sm:$0xff]  ;;  %v645_v5 = vld [vmem:[%s3846_s12 + $0xa] sm:$0xff] }
  0x29   : > { %2420 = vmatmul.mubr.msk.f32.vlgmr.msra.gmra.mrb[0].mxu0 %vm441_vm0, %v412_v44  ;;  %v3123_v44 = vpack.c.bf16 %v2447_v41, %v2445_v40  ;;  %v2464_v8 = vld [vmem:[%s5167_s1 + $0x280] sm:$0xff]  ;;  %v2471_v11 = vld [vmem:[%s5167_s1 + $0x2b8] sm:$0xff]  ;;  %v2473_v17 = vld [vmem:[%s5167_s1 + $0x2c8] sm:$0xff] }
  0x2a   : > { %3086 = vmatpush1.bf16.msra.mxu0 %v3085_v45  ;;  %524 = vmatprep.mubr.f32.mxu0 %v3649_v7  ;;  %v2444_v45 = vld [vmem:[%s5167_s1 + $0x200] sm:$0xff]  ;;  %v646_v13 = vld [vmem:[%s3846_s12 + $0x12] sm:$0xff]  ;;  %v647_v20 = vld [vmem:[%s3846_s12 + $0x1a] sm:$0xf] }
  0x2b   : > { %3088 = vmatprep.subr.bf16.mxu0 %v3087_v46  ;;  %v2446_v46 = vld [vmem:[%s5167_s1 + $0x210] sm:$0xff]  ;;  %v2475_v18 = vld [vmem:[%s5167_s1 + $0x2d8] sm:$0xff]  ;;  %v2477_v24 = vld [vmem:[%s5167_s1 + $0x2e8] sm:$0xff] }
  0x2c   : > { %v3125_v49 = vpack.c.bf16 %v2446_v46, %v2444_v45  ;;  %v2479_v25 = vld [vmem:[%s5167_s1 + $0x2f8] sm:$0xff]  ;;  %v2484_v34 = vld [vmem:[%s5167_s1 + $0x300] sm:$0xff]  ;;  %v783_v46 = vld [vmem:[%s3846_s12 + $0xb] sm:$0xff] }
  0x2d   : > { %2421 = vmatmul.mubr.msk.f32.gmra.mrb[2].mxu0 %vm441_vm0, %v413_v52  ;;  %v2450_v52 = vld [vmem:[%s5167_s1 + $0x230] sm:$0xff]  ;;  %v3151_v27 = vpack.c.bf16 %v2479_v25, %v2477_v24  ;;  %v2487_v31 = vld [vmem:[%s5167_s1 + $0x318] sm:$0xff]  ;;  %v782_v38 = vld [vmem:[%s3846_s12 + $0x3] sm:$0xff] }
  0x2e   : > { %3090 = vmatpush1.bf16.msra.mxu0 %v3089_v51  ;;  %530 = vmatprep.mubr.f32.mxu0 %v3649_v7  ;;  %v2448_v51 = vld [vmem:[%s5167_s1 + $0x220] sm:$0xff]  ;;  %v2522_v24 = vld [vmem:[%s5169_s3 + $0x148] sm:$0xff]  ;;  %v2524_v25 = vld [vmem:[%s5169_s3 + $0x158] sm:$0xff] }
  0x2f   : > { %3092 = vmatprep.subr.bf16.mxu0 %v3091_v53  ;;  %v2457_v53 = vld [vmem:[%s5167_s1 + $0x248] sm:$0xff]  ;;  %v3129_v55 = vpack.c.bf16 %v2450_v52, %v2448_v51  ;;  %v2488_v41 = vld [vmem:[%s5167_s1 + $0x320] sm:$0xff]  ;;  %v2499_v51 = vld [vmem:[%s5167_s1 + $0x378] sm:$0xff] }
  0x30   : > { %v3131_v56 = vpack.c.bf16 %v2459_v54, %v2457_v53  ;;  %v2492_v48 = vld [vmem:[%s5167_s1 + $0x340] sm:$0xff]  ;;  %v784_v53 = vld [vmem:[%s3846_s12 + $0x13] sm:$0xff] }
  0x31   : > { %2422 = vmatmul.mubr.msk.f32.gmra.mrb[4].mxu0 %vm441_vm0, %v414_v59  ;;  %v2461_v59 = vld [vmem:[%s5167_s1 + $0x268] sm:$0xff] }
  0x32   : > { %3094 = vmatpush1.bf16.msra.mxu0 %v3093_v58  ;;  %536 = vmatprep.mubr.f32.mxu0 %v3649_v7  ;;  %v2458_v58 = vld [vmem:[%s5167_s1 + $0x250] sm:$0xff] }
  0x33   : > { %3096 = vmatprep.subr.bf16.mxu0 %v3095_v60  ;;  %v2463_v60 = vld [vmem:[%s5167_s1 + $0x278] sm:$0xff]  ;;  %v3133_v62 = vpack.c.bf16 %v2458_v58, %v2456_v57  ;;  %v2501_v57 = vld [vmem:[%s5167_s1 + $0x388] sm:$0xff] }
  0x34   : > { %v3135_v63 = vpack.c.bf16 %v2463_v60, %v2461_v59  ;;  %v2503_v58 = vld [vmem:[%s5167_s1 + $0x398] sm:$0xff] }
  0x35   : > { %2423 = vmatmul.mubr.msk.f32.gmra.mrb[6].mxu0 %vm441_vm0, %v415_v2  ;;  %v2465_v2 = vld [vmem:[%s5167_s1 + $0x288] sm:$0xff]  ;;  %v785_v60 = vld [vmem:[%s3846_s12 + $0x1b] sm:$0xf] }
  0x36   : > { %3098 = vmatpush1.bf16.msra.mxu0 %v3097_v1  ;;  %619 = vmatprep.mubr.f32.mxu0 %v3649_v7  ;;  %v2462_v1 = vld [vmem:[%s5167_s1 + $0x270] sm:$0xff] }
  0x37   : > { %3100 = vmatprep.subr.bf16.mxu0 %v3099_v3  ;;  %v2467_v3 = vld [vmem:[%s5167_s1 + $0x298] sm:$0xff]  ;;  %v3137_v4 = vpack.c.bf16 %v2462_v1, %v2460_v0  ;;  %v2505_v0 = vld [vmem:[%s5167_s1 + $0x3a8] sm:$0xff] }
  0x38   : > { %v3139_v6 = vpack.c.bf16 %v2467_v3, %v2465_v2  ;;  %v2507_v1 = vld [vmem:[%s5167_s1 + $0x3b8] sm:$0xff] }
  0x39   : > { %v3175_v3 = vpack.c.bf16 %v2507_v1, %v2505_v0 }
  0x3a   : > { %3102 = vmatpush1.bf16.msra.mxu0 %v3101_v9  ;;  %v2466_v9 = vld [vmem:[%s5167_s1 + $0x290] sm:$0xff] }
  0x3b   : > { %3104 = vmatprep.subr.bf16.mxu0 %v3103_v10  ;;  %v2469_v10 = vld [vmem:[%s5167_s1 + $0x2a8] sm:$0xff]  ;;  %v3141_v12 = vpack.c.bf16 %v2466_v9, %v2464_v8 }
  0x3c   : > { %v3143_v14 = vpack.c.bf16 %v2471_v11, %v2469_v10  ;;  %v920_v8 = vld [vmem:[%s3846_s12 + $0x4] sm:$0xff]  ;;  %v921_v9 = vld [vmem:[%s3846_s12 + $0xc] sm:$0xff]  ;;  %v922_v10 = vld [vmem:[%s3846_s12 + $0x14] sm:$0xff] }
  0x3d   : > { %v923_v11 = vld [vmem:[%s3846_s12 + $0x1c] sm:$0xf]  ;;  %s5124_s12 = scalar_lea.hbm %s5177_s11, %s2709_s16 }
  0x3e   : > { %3106 = vmatpush1.bf16.msra.mxu0 %v3105_v15  ;;  %v2468_v15 = vld [vmem:[%s5167_s1 + $0x2a0] sm:$0xff] }
  0x3f   : > { %3108 = vmatprep.subr.bf16.mxu0 %v3107_v16  ;;  %v2470_v16 = vld [vmem:[%s5167_s1 + $0x2b0] sm:$0xff] }
  0x40   : > { %v3145_v19 = vpack.c.bf16 %v2470_v16, %v2468_v15  ;;  %v2513_v15 = vld [vmem:[%s5169_s3 + $0x100] sm:$0xff]  ;;  %v2515_v16 = vld [vmem:[%s5169_s3 + $0x110] sm:$0xff] }
  0x41   : > { %2424 = vmatmul.mubr.msk.f32.vlgmr.msra.gmra.mrb[0].mxu0 %vm441_vm0, %v384_v21  ;;  %v3147_v21 = vpack.c.bf16 %v2475_v18, %v2473_v17  ;;  %v3181_v17 = vpack.c.bf16 %v2515_v16, %v2513_v15  ;;  %v2518_v18 = vld [vmem:[%s5169_s3 + $0x128] sm:$0xff]  ;;  %v2512_v15 = vld [vmem:[%s5168_s2] ss:$0 sm:$0xff] }
  0x42   : > { %3110 = vmatpush1.bf16.msra.mxu0 %v3109_v22  ;;  %625 = vmatprep.mubr.f32.mxu0 %v3649_v7  ;;  %v2472_v22 = vld [vmem:[%s5167_s1 + $0x2c0] sm:$0xff] }
  0x43   : > { %3112 = vmatprep.subr.bf16.mxu0 %v3111_v23  ;;  %v2474_v23 = vld [vmem:[%s5167_s1 + $0x2d0] sm:$0xff] }
  0x44   : > { %v3149_v26 = vpack.c.bf16 %v2474_v23, %v2472_v22  ;;  %v2519_v22 = vld [vmem:[%s5169_s3 + $0x130] sm:$0xff] }
  0x45   : > { %2425 = vmatmul.mubr.msk.f32.gmra.mrb[2].mxu0 %vm441_vm0, %v385_v29  ;;  %v2478_v29 = vld [vmem:[%s5167_s1 + $0x2f0] sm:$0xff] }
  0x46   : > { %3114 = vmatpush1.bf16.msra.mxu0 %v3113_v28  ;;  %631 = vmatprep.mubr.f32.mxu0 %v3649_v7  ;;  %v2476_v28 = vld [vmem:[%s5167_s1 + $0x2e0] sm:$0xff] }
  0x47   : > { %3116 = vmatprep.subr.bf16.mxu0 %v3115_v30  ;;  %v2485_v30 = vld [vmem:[%s5167_s1 + $0x308] sm:$0xff]  ;;  %v3153_v32 = vpack.c.bf16 %v2478_v29, %v2476_v28  ;;  %v2523_v28 = vld [vmem:[%s5169_s3 + $0x150] sm:$0xff] }
  0x48   : > { %v3155_v33 = vpack.c.bf16 %v2487_v31, %v2485_v30  ;;  %v2526_v30 = vld [vmem:[%s5169_s3 + $0x168] sm:$0xff]  ;;  %v2528_v31 = vld [vmem:[%s5169_s3 + $0x178] sm:$0xff] }
  0x49   : > { %2426 = vmatmul.mubr.msk.f32.gmra.mrb[4].mxu0 %vm441_vm0, %v386_v36  ;;  %v2489_v36 = vld [vmem:[%s5167_s1 + $0x328] sm:$0xff] }
  0x4a   : > { %3118 = vmatpush1.bf16.msra.mxu0 %v3117_v35  ;;  %637 = vmatprep.mubr.f32.mxu0 %v3649_v7  ;;  %v2486_v35 = vld [vmem:[%s5167_s1 + $0x310] sm:$0xff] }
  0x4b   : > { %3120 = vmatprep.subr.bf16.mxu0 %v3119_v37  ;;  %v2491_v37 = vld [vmem:[%s5167_s1 + $0x338] sm:$0xff]  ;;  %v3157_v39 = vpack.c.bf16 %v2486_v35, %v2484_v34  ;;  %v2527_v34 = vld [vmem:[%s5169_s3 + $0x170] sm:$0xff] }
  0x4c   : > { %v3159_v40 = vpack.c.bf16 %v2491_v37, %v2489_v36  ;;  %v2530_v36 = vld [vmem:[%s5169_s3 + $0x188] sm:$0xff]  ;;  %v2532_v37 = vld [vmem:[%s5169_s3 + $0x198] sm:$0xff] }
  0x4d   : > { %2427 = vmatmul.mubr.msk.f32.gmra.mrb[6].mxu0 %vm441_vm0, %v387_v43  ;;  %v2493_v43 = vld [vmem:[%s5167_s1 + $0x348] sm:$0xff] }
  0x4e   : > { %3122 = vmatpush1.bf16.msra.mxu0 %v3121_v42  ;;  %749 = vmatprep.mubr.f32.mxu0 %v3649_v7  ;;  %v2490_v42 = vld [vmem:[%s5167_s1 + $0x330] sm:$0xff] }
  0x4f   : > { %3124 = vmatprep.subr.bf16.mxu0 %v3123_v44  ;;  %v2495_v44 = vld [vmem:[%s5167_s1 + $0x358] sm:$0xff]  ;;  %v3161_v45 = vpack.c.bf16 %v2490_v42, %v2488_v41  ;;  %v2534_v42 = vld [vmem:[%s5169_s3 + $0x1a8] sm:$0xff] }
  0x50   : > { %v3163_v47 = vpack.c.bf16 %v2495_v44, %v2493_v43  ;;  %v2536_v43 = vld [vmem:[%s5169_s3 + $0x1b8] sm:$0xff]  ;;  %v2533_v44 = vld [vmem:[%s5169_s3 + $0x1a0] sm:$0xff] }
  0x52   : > { %3126 = vmatpush1.bf16.msra.mxu0 %v3125_v49  ;;  %v2494_v49 = vld [vmem:[%s5167_s1 + $0x350] sm:$0xff] }
  0x53   : > { %3128 = vmatprep.subr.bf16.mxu0 %v3127_v50  ;;  %v2497_v50 = vld [vmem:[%s5167_s1 + $0x368] sm:$0xff]  ;;  %v3165_v52 = vpack.c.bf16 %v2494_v49, %v2492_v48  ;;  %v2540_v48 = vld [vmem:[%s5169_s3 + $0x1d8] sm:$0xff] }
  0x54   : > { %v3167_v54 = vpack.c.bf16 %v2499_v51, %v2497_v50  ;;  %v2537_v51 = vld [vmem:[%s5169_s3 + $0x1c0] sm:$0xff] }
  0x56   : > { %3130 = vmatpush1.bf16.msra.mxu0 %v3129_v55  ;;  %v2496_v55 = vld [vmem:[%s5167_s1 + $0x360] sm:$0xff] }
  0x57   : > { %3132 = vmatprep.subr.bf16.mxu0 %v3131_v56  ;;  %v2498_v56 = vld [vmem:[%s5167_s1 + $0x370] sm:$0xff] }
  0x58   : > { %v3169_v59 = vpack.c.bf16 %v2498_v56, %v2496_v55 }
  0x59   : > { %2452 = vmatmul.mubr.msk.f32.vlgmr.msra.gmra.mrb[0].mxu0 %vm441_vm0, %v644_v61  ;;  %v3171_v61 = vpack.c.bf16 %v2503_v58, %v2501_v57  ;;  %v2541_v57 = vld [vmem:[%s5169_s3 + $0x1e0] sm:$0xff]  ;;  %v2543_v58 = vld [vmem:[%s5169_s3 + $0x1f0] sm:$0xff] }
  0x5a   : > { %3134 = vmatpush1.bf16.msra.mxu0 %v3133_v62  ;;  %755 = vmatprep.mubr.f32.mxu0 %v3649_v7  ;;  %v2500_v62 = vld [vmem:[%s5167_s1 + $0x380] sm:$0xff] }
  0x5b   : > { %3136 = vmatprep.subr.bf16.mxu0 %v3135_v63  ;;  %v2502_v63 = vld [vmem:[%s5167_s1 + $0x390] sm:$0xff] }
  0x5c   : > { %v3173_v2 = vpack.c.bf16 %v2502_v63, %v2500_v62 }
  0x5d   : > { %2453 = vmatmul.mubr.msk.f32.gmra.mrb[2].mxu0 %vm441_vm0, %v645_v5  ;;  %v2506_v5 = vld [vmem:[%s5167_s1 + $0x3b0] sm:$0xff] }
  0x5e   : > { %3138 = vmatpush1.bf16.msra.mxu0 %v3137_v4  ;;  %761 = vmatprep.mubr.f32.mxu0 %v3649_v7  ;;  %v2504_v4 = vld [vmem:[%s5167_s1 + $0x3a0] sm:$0xff] }
  0x5f   : > { %3140 = vmatprep.subr.bf16.mxu0 %v3139_v6  ;;  %v3177_v6 = vpack.c.bf16 %v2506_v5, %v2504_v4 }
  0x61   : > { %2454 = vmatmul.mubr.msk.f32.gmra.mrb[4].mxu0 %vm441_vm0, %v646_v13  ;;  %v2516_v13 = vld [vmem:[%s5169_s3 + $0x118] sm:$0xff] }
  0x62   : > { %3142 = vmatpush1.bf16.msra.mxu0 %v3141_v12  ;;  %767 = vmatprep.mubr.f32.mxu0 %v3649_v7  ;;  %v2514_v12 = vld [vmem:[%s5169_s3 + $0x108] sm:$0xff] }
  0x63   : > { %3144 = vmatprep.subr.bf16.mxu0 %v3143_v14  ;;  %v3179_v14 = vpack.c.bf16 %v2516_v13, %v2514_v12 }
  0x65   : > { %2455 = vmatmul.mubr.msk.f32.gmra.mrb[6].mxu0 %vm441_vm0, %v647_v20  ;;  %3180 = vmatprep.subr.bf16.mxu1 %v3179_v14 }
  0x66   : > { %3146 = vmatpush1.bf16.msra.mxu0 %v3145_v19  ;;  %887 = vmatprep.mubr.f32.mxu0 %v3649_v7  ;;  %v2520_v19 = vld [vmem:[%s5169_s3 + $0x138] sm:$0xff] }
  0x67   : > { %3148 = vmatprep.subr.bf16.mxu0 %v3147_v21  ;;  %3182 = vmatpush1.bf16.msra.mxu1 %v3181_v17  ;;  %v3183_v20 = vpack.c.bf16 %v2520_v19, %v2518_v18  ;;  %v2517_v21 = vld [vmem:[%s5169_s3 + $0x120] sm:$0xff] }
  0x68   : > { %v3185_v23 = vpack.c.bf16 %v2519_v22, %v2517_v21  ;;  %v1088_v21 = vld [vmem:[%s5169_s3 + $0x10] sm:$0xff] }
  0x69   : > { %3184 = vmatprep.subr.bf16.mxu1 %v3183_v20  ;;  %v1086_v20 = vld [vmem:[%s5169_s3] sm:$0xff] }
  0x6a   : > { %3150 = vmatpush1.bf16.msra.mxu0 %v3149_v26  ;;  %v3187_v26 = vpack.c.bf16 %v2524_v25, %v2522_v24  ;;  %v3213_v24 = vpack.c.bf16 %v1088_v21, %v1086_v20  ;;  %v2546_v20 = vld [vmem:[%s5169_s3 + $0x208] sm:$0xff]  ;;  %v2548_v21 = vld [vmem:[%s5169_s3 + $0x218] sm:$0xff] }
  0x6b   : > { %3152 = vmatprep.subr.bf16.mxu0 %v3151_v27  ;;  %3186 = vmatpush1.bf16.msra.mxu1 %v3185_v23  ;;  %v2521_v27 = vld [vmem:[%s5169_s3 + $0x140] sm:$0xff] }
  0x6c   : > { %v3189_v29 = vpack.c.bf16 %v2523_v28, %v2521_v27  ;;  %3188 = vmatprep.subr.bf16.mxu1 %v3187_v26  ;;  %v1091_v26 = vld [vmem:[%s5169_s3 + $0x28] sm:$0xff]  ;;  %v1093_v27 = vld [vmem:[%s5169_s3 + $0x38] sm:$0xff] }
  0x6e   : > { %3154 = vmatpush1.bf16.msra.mxu0 %v3153_v32  ;;  %v3191_v32 = vpack.c.bf16 %v2528_v31, %v2526_v30 }
  0x6f   : > { %3156 = vmatprep.subr.bf16.mxu0 %v3155_v33  ;;  %3190 = vmatpush1.bf16.msra.mxu1 %v3189_v29  ;;  %v2525_v33 = vld [vmem:[%s5169_s3 + $0x160] sm:$0xff] }
  0x70   : > { %v3193_v35 = vpack.c.bf16 %v2527_v34, %v2525_v33  ;;  %3192 = vmatprep.subr.bf16.mxu1 %v3191_v32 }
  0x71   : > { %2480 = vmatmul.mubr.msk.f32.vlgmr.msra.gmra.mrb[0].mxu0 %vm441_vm0, %v782_v38  ;;  %v3195_v38 = vpack.c.bf16 %v2532_v37, %v2530_v36  ;;  %v3215_v36 = vpack.c.bf16 %v1093_v27, %v1091_v26  ;;  %v1090_v37 = vld [vmem:[%s5169_s3 + $0x20] sm:$0xff]  ;;  %v2547_v27 = vld [vmem:[%s5169_s3 + $0x210] sm:$0xff] }
  0x72   : > { %3158 = vmatpush1.bf16.msra.mxu0 %v3157_v39  ;;  %893 = vmatprep.mubr.f32.mxu0 %v3649_v7  ;;  %v2529_v39 = vld [vmem:[%s5169_s3 + $0x180] sm:$0xff] }
  0x73   : > { %3160 = vmatprep.subr.bf16.mxu0 %v3159_v40  ;;  %3194 = vmatpush1.bf16.msra.mxu1 %v3193_v35  ;;  %v2531_v40 = vld [vmem:[%s5169_s3 + $0x190] sm:$0xff]  ;;  %v2545_v26 = vld [vmem:[%s5169_s3 + $0x200] sm:$0xff] }
  0x74   : > { %v3197_v41 = vpack.c.bf16 %v2531_v40, %v2529_v39  ;;  %3196 = vmatprep.subr.bf16.mxu1 %v3195_v38  ;;  %v1092_v38 = vld [vmem:[%s5169_s3 + $0x30] sm:$0xff]  ;;  %v1095_v40 = vld [vmem:[%s5169_s3 + $0x48] sm:$0xff] }
  0x75   : > { %2481 = vmatmul.mubr.msk.f32.gmra.mrb[2].mxu0 %vm441_vm0, %v783_v46  ;;  %v2535_v46 = vld [vmem:[%s5169_s3 + $0x1b0] sm:$0xff] }
  0x76   : > { %3162 = vmatpush1.bf16.msra.mxu0 %v3161_v45  ;;  %899 = vmatprep.mubr.f32.mxu0 %v3649_v7  ;;  %v3199_v45 = vpack.c.bf16 %v2536_v43, %v2534_v42  ;;  %v3201_v49 = vpack.c.bf16 %v2535_v46, %v2533_v44 }
  0x77   : > { %3164 = vmatprep.subr.bf16.mxu0 %v3163_v47  ;;  %3198 = vmatpush1.bf16.msra.mxu1 %v3197_v41  ;;  %v2538_v47 = vld [vmem:[%s5169_s3 + $0x1c8] sm:$0xff]  ;;  %v1097_v41 = vld [vmem:[%s5169_s3 + $0x58] sm:$0xff] }
  0x78   : > { %v3203_v50 = vpack.c.bf16 %v2540_v48, %v2538_v47  ;;  %3200 = vmatprep.subr.bf16.mxu1 %v3199_v45  ;;  %v3217_v45 = vpack.c.bf16 %v1092_v38, %v1090_v37  ;;  %v3219_v46 = vpack.c.bf16 %v1097_v41, %v1095_v40  ;;  %v1094_v47 = vld [vmem:[%s5169_s3 + $0x40] sm:$0xff]  ;;  %v1096_v48 = vld [vmem:[%s5169_s3 + $0x50] sm:$0xff]  ;;  %v2554_v37 = vld [vmem:[%s5169_s3 + $0x248] sm:$0xff] }
  0x79   : > { %2482 = vmatmul.mubr.msk.f32.gmra.mrb[4].mxu0 %vm441_vm0, %v784_v53  ;;  %v2542_v53 = vld [vmem:[%s5169_s3 + $0x1e8] sm:$0xff]  ;;  %v2556_v38 = vld [vmem:[%s5169_s3 + $0x258] sm:$0xff]  ;;  %v2553_v41 = vld [vmem:[%s5169_s3 + $0x240] sm:$0xff] }
  0x7a   : > { %3166 = vmatpush1.bf16.msra.mxu0 %v3165_v52  ;;  %905 = vmatprep.mubr.f32.mxu0 %v3649_v7  ;;  %v2539_v52 = vld [vmem:[%s5169_s3 + $0x1d0] sm:$0xff]  ;;  %v3251_v40 = vpack.c.bf16 %v2556_v38, %v2554_v37 }
  0x7b   : > { %3168 = vmatprep.subr.bf16.mxu0 %v3167_v54  ;;  %v2544_v54 = vld [vmem:[%s5169_s3 + $0x1f8] sm:$0xff]  ;;  %3202 = vmatpush1.bf16.msra.mxu1 %v3201_v49  ;;  %v3205_v55 = vpack.c.bf16 %v2539_v52, %v2537_v51  ;;  %v1099_v49 = vld [vmem:[%s5169_s3 + $0x68] sm:$0xff]  ;;  %v2642_v51 = vld [vmem:[%s5171_s5 + $0x80] sm:$0xff] }
  0x7c   : > { %3204 = vmatprep.subr.bf16.mxu1 %v3203_v50  ;;  %v3207_v56 = vpack.c.bf16 %v2544_v54, %v2542_v53  ;;  %v1101_v50 = vld [vmem:[%s5169_s3 + $0x78] sm:$0xff]  ;;  %v2643_v52 = vld [vmem:[%s5171_s5 + $0x88] sm:$0xff]  ;;  %v3221_v53 = vpack.c.bf16 %v1096_v48, %v1094_v47 }
  0x7d   : > { %2483 = vmatmul.mubr.msk.f32.gmra.mrb[6].mxu0 %vm441_vm0, %v785_v60  ;;  %v1089_v60 = vld [vmem:[%s5169_s3 + $0x18] sm:$0xff]  ;;  %v3340_v54 = vpack.c.bf16 %v2643_v52, %v2642_v51  ;;  %v2562_v51 = vld [vmem:[%s5169_s3 + $0x288] sm:$0xff] }
  0x7e   : > { %3170 = vmatpush1.bf16.msra.mxu0 %v3169_v59  ;;  %1025 = vmatprep.mubr.f32.mxu0 %v3649_v7  ;;  %v1087_v59 = vld [vmem:[%s5169_s3 + $0x8] sm:$0xff]  ;;  %v2564_v52 = vld [vmem:[%s5169_s3 + $0x298] sm:$0xff] }
  0x7f   : > { %3172 = vmatprep.subr.bf16.mxu0 %v3171_v61  ;;  %3206 = vmatpush1.bf16.msra.mxu1 %v3205_v55  ;;  %v3209_v61 = vpack.c.bf16 %v2543_v58, %v2541_v57  ;;  %v3211_v62 = vpack.c.bf16 %v1089_v60, %v1087_v59  ;;  %v3223_v55 = vpack.c.bf16 %v1101_v50, %v1099_v49  ;;  %v1100_v57 = vld [vmem:[%s5169_s3 + $0x70] sm:$0xff]  ;;  %v3650_v58 = vmov 0.0|0.0   ;;  %v1103_v59 = vld [vmem:[%s5169_s3 + $0x88] sm:$0xff]  ;;  %v1105_v60 = vld [vmem:[%s5169_s3 + $0x98] sm:$0xff] }
  0x80   : > { %3208 = vmatprep.subr.bf16.mxu1 %v3207_v56  ;;  %v1098_v56 = vld [vmem:[%s5169_s3 + $0x60] sm:$0xff]  ;;  %v2559_v50 = vld [vmem:[%s5169_s3 + $0x270] sm:$0xff] }
  0x81   : > { %v2557_v49 = vld [vmem:[%s5169_s3 + $0x260] sm:$0xff] }
  0x82   : > { %3174 = vmatpush1.bf16.msra.mxu0 %v3173_v2 }
  0x83   : > { %3176 = vmatprep.subr.bf16.mxu0 %v3175_v3  ;;  %3210 = vmatpush1.bf16.msra.mxu1 %v3209_v61  ;;  %v3225_v61 = vpack.c.bf16 %v1100_v57, %v1098_v56  ;;  %v2563_v56 = vld [vmem:[%s5169_s3 + $0x290] sm:$0xff]  ;;  %v2566_v57 = vld [vmem:[%s5169_s3 + $0x2a8] sm:$0xff] }
  0x84   : > { %3212 = vmatprep.subr.bf16.mxu1 %v3211_v62  ;;  %v3227_v62 = vpack.c.bf16 %v1105_v60, %v1103_v59  ;;  %v2568_v59 = vld [vmem:[%s5169_s3 + $0x2b8] sm:$0xff] }
  0x86   : > { %3178 = vmatpush1.bf16.msra.mxu0 %v3177_v6 }
  0x87   : > { %3339 = vmatprep.subr.bf16.mxu0 %v3650_v58 }
  0x89   : > { %2508 = vmatmul.mubr.msk.f32.vlgmr.msra.gmra.mrb[0].mxu0 %vm441_vm0, %v920_v8 }
  0x8a   : > { %1031 = vmatprep.mubr.f32.mxu0 %v3649_v7  ;;  %3341 = vmatpush3.bf16.msra.mxu0 %v3340_v54  ;;  %v3259_v54 = vpack.c.bf16 %v2564_v52, %v2562_v51  ;;  %v2597_v52 = vld [vmem:[%s5169_s3 + $0x3a0] sm:$0xff] }
  0x8b   : > { %3342 = vmatprep.subr.bf16.mxu0 %v3650_v58 }
  0x8d   : > { %2509 = vmatmul.mubr.msk.f32.gmra.mrb[2].mxu0 %vm441_vm0, %v921_v9 }
  0x8e   : > { %1037 = vmatprep.mubr.f32.mxu0 %v3649_v7 }
  0x91   : > { %2510 = vmatmul.mubr.msk.f32.gmra.mrb[4].mxu0 %vm441_vm0, %v922_v10 }
  0x92   : > { %1043 = vmatprep.mubr.f32.mxu0 %v3649_v7 }
  0x95   : > { %2511 = vmatmul.mubr.msk.f32.gmra.mrb[6].mxu0 %vm441_vm0, %v923_v11 }
  0x96   : > { %2858 = vmatprep.mubr.msk.f32.mxu0 %vm3651_vm5, %v3649_v7 }
 0x15c   : > { %v1027_v63 = vpop.f32.mrb[0].mxu0 }
 0x15d   : > { %v1029_v0 = vpop.f32.mrb[1].mxu0 }
 0x15e   : > { %v1058_v1 = vmax.f32 %v1027_v63, %v1029_v0  ;;  %v1102_v63 = vld [vmem:[%s5169_s3 + $0x80] sm:$0xff]  ;;  %v1104_v0 = vld [vmem:[%s5169_s3 + $0x90] sm:$0xff] }
 0x160   : > { %1062 = vst [vmem:[#allocation2] sm:$0xff] %v1058_v1  ;;  %v1033_v2 = vpop.f32.mrb[2].mxu0  ;;  %v1107_v1 = vld [vmem:[%s5169_s3 + $0xa8] sm:$0xff] }
 0x161   : > { %v1035_v3 = vpop.f32.mrb[3].mxu0 }
 0x162   : > { %v1059_v4 = vmax.f32 %v1033_v2, %v1035_v3  ;;  %v1109_v2 = vld [vmem:[%s5169_s3 + $0xb8] sm:$0xff]  ;;  %v3229_v3 = vpack.c.bf16 %v1104_v0, %v1102_v63  ;;  %v2567_v63 = vld [vmem:[%s5169_s3 + $0x2b0] sm:$0xff]  ;;  %v2570_v0 = vld [vmem:[%s5169_s3 + $0x2c8] sm:$0xff] }
 0x164   : > { %1063 = vst [vmem:[#allocation2 + $0x8] sm:$0xff] %v1059_v4  ;;  %v1039_v5 = vpop.f32.mrb[4].mxu0  ;;  %v3231_v4 = vpack.c.bf16 %v1109_v2, %v1107_v1  ;;  %v2572_v1 = vld [vmem:[%s5169_s3 + $0x2d8] sm:$0xff] }
 0x165   : > { %v1041_v6 = vpop.f32.mrb[5].mxu0 }
 0x166   : > { %v1060_v8 = vmax.f32 %v1039_v5, %v1041_v6  ;;  %v1106_v5 = vld [vmem:[%s5169_s3 + $0xa0] sm:$0xff]  ;;  %v1108_v6 = vld [vmem:[%s5169_s3 + $0xb0] sm:$0xff] }
 0x168   : > { %1064 = vst [vmem:[#allocation2 + $0x10] sm:$0xff] %v1060_v8  ;;  %v1045_v9 = vpop.f32.mrb[6].mxu0  ;;  %v1111_v8 = vld [vmem:[%s5169_s3 + $0xc8] sm:$0xff] }
 0x169   : > { %v1047_v10 = vpop.f32.mrb[7].mxu0 }
 0x16a   : > { %v1061_v11 = vmax.f32 %v1045_v9, %v1047_v10  ;;  %v1113_v9 = vld [vmem:[%s5169_s3 + $0xd8] sm:$0xff]  ;;  %v3233_v10 = vpack.c.bf16 %v1108_v6, %v1106_v5  ;;  %v2571_v5 = vld [vmem:[%s5169_s3 + $0x2d0] sm:$0xff]  ;;  %v2574_v6 = vld [vmem:[%s5169_s3 + $0x2e8] sm:$0xff] }
 0x16b   : > { %v1066_v12 = vld [vmem:[#allocation2] ss:$2 sm:$0xff]  ;;  %v1070_v13 = vld [vmem:[#allocation2 + $0x1] ss:$2 sm:$0xff] }
 0x16c   : > { %1065 = vst [vmem:[#allocation2 + $0x18] sm:$0xf] %v1061_v11  ;;  %v1073_v14 = vmax.f32 %v1066_v12, %v1070_v13  ;;  %v3235_v11 = vpack.c.bf16 %v1113_v9, %v1111_v8  ;;  %v1110_v12 = vld [vmem:[%s5169_s3 + $0xc0] sm:$0xff]  ;;  %v1112_v13 = vld [vmem:[%s5169_s3 + $0xd0] sm:$0xff]  ;;  %v2576_v8 = vld [vmem:[%s5169_s3 + $0x2f8] sm:$0xff] }
 0x16e   : > { %v1082_v16 = vadd.f32 %v2512_v15, %v1073_v14  ;;  %v1115_v14 = vld [vmem:[%s5169_s3 + $0xe8] sm:$0xff] }
 0x170   : > { %v4300_v22 = vmax.f32 %v1082_v16, 0.0  ;;  %v3237_v16 = vpack.c.bf16 %v1112_v13, %v1110_v12  ;;  %v2575_v12 = vld [vmem:[%s5169_s3 + $0x2f0] sm:$0xff]  ;;  %v2578_v13 = vld [vmem:[%s5169_s3 + $0x308] sm:$0xff] }
 0x172   : > { %v1154_v28 = vrot.slane %v4300_v22, 1  ;;  %v1347_v29 = vrot.slane %v4300_v22, 2  ;;  %v1467_v30 = vrot.slane %v4300_v22, 3  ;;  %v1587_v31 = vrot.slane %v4300_v22, 4 }
 0x173   : > { %v1068_v17 = vld [vmem:[#allocation2 + $0x10] ss:$2 sm:$0x3f]  ;;  %v1072_v18 = vld [vmem:[#allocation2 + $0x11] ss:$2 sm:$0x3f] }
 0x174   : > { %v1074_v19 = vmax.f32 %v1068_v17, %v1072_v18  ;;  %v1114_v18 = vld [vmem:[%s5169_s3 + $0xe0] sm:$0xff] }
 0x176   : > { %v1083_v23 = vadd.f32 %v2512_v15, %v1074_v19  ;;  %v1117_v15 = vld [vmem:[%s5169_s3 + $0xf8] sm:$0xff]  ;;  %v1116_v19 = vld [vmem:[%s5169_s3 + $0xf0] sm:$0xff] }
 0x177   : > { %v3239_v17 = vpack.c.bf16 %v1117_v15, %v1115_v14  ;;  %v2580_v14 = vld [vmem:[%s5169_s3 + $0x318] sm:$0xff] }
 0x178   : > { %v4302_v25 = vmax.f32 %v1083_v23, 0.0  ;;  %v3241_v23 = vpack.c.bf16 %v1116_v19, %v1114_v18  ;;  %v2579_v18 = vld [vmem:[%s5169_s3 + $0x310] sm:$0xff]  ;;  %v2582_v19 = vld [vmem:[%s5169_s3 + $0x328] sm:$0xff] }
 0x17a   : > { %v1155_v32 = vrot.slane %v4302_v25, 1  ;;  %v1348_v33 = vrot.slane %v4302_v25, 2  ;;  %v1468_v34 = vrot.slane %v4302_v25, 3  ;;  %v1588_v35 = vrot.slane %v4302_v25, 4 }
 0x17c   : > { %v1156_v39 = vsel %vm1153_vm1, %v1154_v28, %v1155_v32  ;;  %v4334_v42 = vsel %vm1346_vm2, %v1347_v29, %v1348_v33  ;;  %v4339_v43 = vsel %vm1466_vm3, %v1467_v30, %v1468_v34  ;;  %v4344_v44 = vsel %vm1586_vm4, %v1587_v31, %v1588_v35  ;;  %v2550_v28 = vld [vmem:[%s5169_s3 + $0x228] sm:$0xff]  ;;  %v2552_v29 = vld [vmem:[%s5169_s3 + $0x238] sm:$0xff] }
 0x17d   : > { %1224 = vmatmul.mubr.f32.vlgmr.msra.gmra.mrb[0].mxu1 %v1156_v39  ;;  %v3245_v30 = vpack.c.bf16 %v2547_v27, %v2545_v26  ;;  %v3247_v31 = vpack.c.bf16 %v2552_v29, %v2550_v28  ;;  %v2583_v26 = vld [vmem:[%s5169_s3 + $0x330] sm:$0xff]  ;;  %v2586_v27 = vld [vmem:[%s5169_s3 + $0x348] sm:$0xff]  ;;  %v2588_v28 = vld [vmem:[%s5169_s3 + $0x358] sm:$0xff] }
 0x17e   : > { %3214 = vmatpush1.bf16.msra.mxu1 %v3213_v24  ;;  %1229 = vmatprep.mubr.f32.mxu1 %v3649_v7  ;;  %v3243_v24 = vpack.c.bf16 %v2548_v21, %v2546_v20  ;;  %v2584_v20 = vld [vmem:[%s5169_s3 + $0x338] sm:$0xff] }
 0x17f   : > { %3216 = vmatprep.subr.bf16.mxu1 %v3215_v36  ;;  %v2551_v36 = vld [vmem:[%s5169_s3 + $0x230] sm:$0xff] }
 0x181   : > { %1230 = vmatmul.mubr.f32.gmra.mrb[2].mxu1 %v1155_v32  ;;  %v2549_v32 = vld [vmem:[%s5169_s3 + $0x220] sm:$0xff] }
 0x182   : > { %3218 = vmatpush1.bf16.msra.mxu1 %v3217_v45  ;;  %1300 = vmatprep.mubr.f32.mxu1 %v3649_v7  ;;  %v3249_v39 = vpack.c.bf16 %v2551_v36, %v2549_v32  ;;  %v2555_v45 = vld [vmem:[%s5169_s3 + $0x250] sm:$0xff]  ;;  %v2590_v36 = vld [vmem:[%s5169_s3 + $0x368] sm:$0xff] }
 0x183   : > { %3220 = vmatprep.subr.bf16.mxu1 %v3219_v46  ;;  %v2558_v46 = vld [vmem:[%s5169_s3 + $0x268] sm:$0xff]  ;;  %v3253_v47 = vpack.c.bf16 %v2555_v45, %v2553_v41  ;;  %v2587_v32 = vld [vmem:[%s5169_s3 + $0x350] sm:$0xff] }
 0x184   : > { %v2594_v41 = vld [vmem:[%s5169_s3 + $0x388] sm:$0xff] }
 0x186   : > { %3222 = vmatpush1.bf16.msra.mxu1 %v3221_v53  ;;  %v3257_v53 = vpack.c.bf16 %v2559_v50, %v2557_v49  ;;  %v2600_v49 = vld [vmem:[%s5169_s3 + $0x3b8] sm:$0xff] }
 0x187   : > { %3224 = vmatprep.subr.bf16.mxu1 %v3223_v55  ;;  %v2561_v55 = vld [vmem:[%s5169_s3 + $0x280] sm:$0xff] }
 0x188   : > { %v3261_v60 = vpack.c.bf16 %v2563_v56, %v2561_v55  ;;  %v2604_v55 = vld [vmem:[%s5169_s3 + $0x3d8] sm:$0xff] }
 0x18a   : > { %3226 = vmatpush1.bf16.msra.mxu1 %v3225_v61  ;;  %v3263_v61 = vpack.c.bf16 %v2568_v59, %v2566_v57  ;;  %v2601_v59 = vld [vmem:[%s5169_s3 + $0x3c0] sm:$0xff] }
 0x18b   : > { %3228 = vmatprep.subr.bf16.mxu1 %v3227_v62  ;;  %v2565_v62 = vld [vmem:[%s5169_s3 + $0x2a0] sm:$0xff] }
 0x18c   : > { %v3265_v2 = vpack.c.bf16 %v2567_v63, %v2565_v62  ;;  %v2608_v62 = vld [vmem:[%s5169_s3 + $0x3f8] sm:$0xff] }
 0x18e   : > { %3230 = vmatpush1.bf16.msra.mxu1 %v3229_v3  ;;  %v3267_v3 = vpack.c.bf16 %v2572_v1, %v2570_v0  ;;  %v2605_v1 = vld [vmem:[%s5169_s3 + $0x3e0] sm:$0xff] }
 0x18f   : > { %3232 = vmatprep.subr.bf16.mxu1 %v3231_v4  ;;  %v2569_v4 = vld [vmem:[%s5169_s3 + $0x2c0] sm:$0xff] }
 0x190   : > { %v3269_v9 = vpack.c.bf16 %v2571_v5, %v2569_v4  ;;  %v2612_v4 = vld [vmem:[%s5169_s3 + $0x418] sm:$0xff] }
 0x192   : > { %3234 = vmatpush1.bf16.msra.mxu1 %v3233_v10  ;;  %v3271_v10 = vpack.c.bf16 %v2576_v8, %v2574_v6  ;;  %v2609_v8 = vld [vmem:[%s5169_s3 + $0x400] sm:$0xff] }
 0x193   : > { %3236 = vmatprep.subr.bf16.mxu1 %v3235_v11  ;;  %v2573_v11 = vld [vmem:[%s5169_s3 + $0x2e0] sm:$0xff] }
 0x194   : > { %v3273_v15 = vpack.c.bf16 %v2575_v12, %v2573_v11  ;;  %v2616_v11 = vld [vmem:[%s5169_s3 + $0x438] sm:$0xff] }
 0x196   : > { %3238 = vmatpush1.bf16.msra.mxu1 %v3237_v16  ;;  %v3275_v16 = vpack.c.bf16 %v2580_v14, %v2578_v13  ;;  %v2613_v14 = vld [vmem:[%s5169_s3 + $0x420] sm:$0xff] }
 0x197   : > { %3240 = vmatprep.subr.bf16.mxu1 %v3239_v17  ;;  %v2577_v17 = vld [vmem:[%s5169_s3 + $0x300] sm:$0xff] }
 0x198   : > { %v3277_v21 = vpack.c.bf16 %v2579_v18, %v2577_v17  ;;  %v2620_v17 = vld [vmem:[%s5169_s3 + $0x458] sm:$0xff] }
 0x19a   : > { %3242 = vmatpush1.bf16.msra.mxu1 %v3241_v23  ;;  %v3279_v23 = vpack.c.bf16 %v2584_v20, %v2582_v19  ;;  %v2617_v20 = vld [vmem:[%s5169_s3 + $0x440] sm:$0xff] }
 0x19b   : > { %3244 = vmatprep.subr.bf16.mxu1 %v3243_v24  ;;  %v2581_v24 = vld [vmem:[%s5169_s3 + $0x320] sm:$0xff] }
 0x19c   : > { %v3281_v29 = vpack.c.bf16 %v2583_v26, %v2581_v24 }
 0x19d   : > { %1301 = vmatmul.mubr.f32.vlgmr.msra.gmra.mrb[0].mxu1 %v4300_v22  ;;  %v2560_v22 = vld [vmem:[%s5169_s3 + $0x278] sm:$0xff] }
 0x19e   : > { %3246 = vmatpush1.bf16.msra.mxu1 %v3245_v30  ;;  %1306 = vmatprep.mubr.f32.mxu1 %v3649_v7  ;;  %v3255_v48 = vpack.c.bf16 %v2560_v22, %v2558_v46  ;;  %v3283_v30 = vpack.c.bf16 %v2588_v28, %v2586_v27  ;;  %v2593_v22 = vld [vmem:[%s5169_s3 + $0x380] sm:$0xff]  ;;  %v2623_v28 = vld [vmem:[%s5169_s3 + $0x470] sm:$0xff] }
 0x19f   : > { %3248 = vmatprep.subr.bf16.mxu1 %v3247_v31  ;;  %v2585_v31 = vld [vmem:[%s5169_s3 + $0x340] sm:$0xff] }
 0x1a0   : > { %v3285_v37 = vpack.c.bf16 %v2587_v32, %v2585_v31  ;;  %v2621_v27 = vld [vmem:[%s5169_s3 + $0x460] sm:$0xff] }
 0x1a1   : > { %1307 = vmatmul.mubr.f32.gmra.mrb[2].mxu1 %v4302_v25  ;;  %v2625_v32 = vld [vmem:[%s5169_s3 + $0x480] sm:$0xff] }
 0x1a2   : > { %3250 = vmatpush1.bf16.msra.mxu1 %v3249_v39  ;;  %1416 = vmatprep.mubr.f32.mxu1 %v3649_v7  ;;  %v2589_v39 = vld [vmem:[%s5169_s3 + $0x360] sm:$0xff] }
 0x1a3   : > { %3252 = vmatprep.subr.bf16.mxu1 %v3251_v40  ;;  %v2591_v40 = vld [vmem:[%s5169_s3 + $0x370] sm:$0xff]  ;;  %v2646_v25 = vld [vmem:[%s5171_s5 + $0xa0] sm:$0xff] }
 0x1a4   : > { %v3289_v45 = vpack.c.bf16 %v2591_v40, %v2589_v39  ;;  %v2629_v40 = vld [vmem:[%s5169_s3 + $0x4a0] sm:$0xff] }
 0x1a6   : > { %3254 = vmatpush1.bf16.msra.mxu1 %v3253_v47  ;;  %v2595_v47 = vld [vmem:[%s5169_s3 + $0x390] sm:$0xff] }
 0x1a7   : > { %3256 = vmatprep.subr.bf16.mxu1 %v3255_v48  ;;  %v2598_v48 = vld [vmem:[%s5169_s3 + $0x3a8] sm:$0xff]  ;;  %v3293_v50 = vpack.c.bf16 %v2595_v47, %v2593_v22  ;;  %v2633_v47 = vld [vmem:[%s5169_s3 + $0x4c0] sm:$0xff] }
 0x1a8   : > { %v3295_v51 = vpack.c.bf16 %v2600_v49, %v2598_v48  ;;  %v2635_v48 = vld [vmem:[%s5169_s3 + $0x4d0] sm:$0xff]  ;;  %v2638_v49 = vld [vmem:[%s5169_s3 + $0x4e8] sm:$0xff] }
 0x1aa   : > { %3258 = vmatpush1.bf16.msra.mxu1 %v3257_v53  ;;  %v2599_v53 = vld [vmem:[%s5169_s3 + $0x3b0] sm:$0xff] }
 0x1ab   : > { %3260 = vmatprep.subr.bf16.mxu1 %v3259_v54  ;;  %v2602_v54 = vld [vmem:[%s5169_s3 + $0x3c8] sm:$0xff]  ;;  %v3297_v56 = vpack.c.bf16 %v2599_v53, %v2597_v52  ;;  %v2637_v53 = vld [vmem:[%s5169_s3 + $0x4e0] sm:$0xff] }
 0x1ac   : > { %v3299_v57 = vpack.c.bf16 %v2604_v55, %v2602_v54  ;;  %v2639_v54 = vld [vmem:[%s5169_s3 + $0x4f0] sm:$0xff] }
 0x1ad   : > { %v3337_v55 = vpack.c.bf16 %v2639_v54, %v2637_v53  ;;  %v2690_v53 = vld [vmem:[%s5171_s5 + $0x200] sm:$0xff]  ;;  %v2691_v54 = vld [vmem:[%s5171_s5 + $0x208] sm:$0xff] }
 0x1ae   : > { %3262 = vmatpush1.bf16.msra.mxu1 %v3261_v60  ;;  %v2603_v60 = vld [vmem:[%s5169_s3 + $0x3d0] sm:$0xff] }
 0x1af   : > { %3264 = vmatprep.subr.bf16.mxu1 %v3263_v61  ;;  %v2606_v61 = vld [vmem:[%s5169_s3 + $0x3e8] sm:$0xff]  ;;  %v3301_v63 = vpack.c.bf16 %v2603_v60, %v2601_v59  ;;  %v2644_v60 = vld [vmem:[%s5171_s5 + $0x90] sm:$0xff] }
 0x1b0   : > { %v3303_v0 = vpack.c.bf16 %v2608_v62, %v2606_v61  ;;  %v2645_v61 = vld [vmem:[%s5171_s5 + $0x98] sm:$0xff] }
 0x1b1   : > { %v3343_v62 = vpack.c.bf16 %v2645_v61, %v2644_v60  ;;  %v2692_v60 = vld [vmem:[%s5171_s5 + $0x210] sm:$0xff]  ;;  %v2693_v61 = vld [vmem:[%s5171_s5 + $0x218] sm:$0xff] }
 0x1b2   : > { %3266 = vmatpush1.bf16.msra.mxu1 %v3265_v2  ;;  %v2607_v2 = vld [vmem:[%s5169_s3 + $0x3f0] sm:$0xff] }
 0x1b3   : > { %3268 = vmatprep.subr.bf16.mxu1 %v3267_v3  ;;  %v2610_v3 = vld [vmem:[%s5169_s3 + $0x408] sm:$0xff]  ;;  %v3305_v5 = vpack.c.bf16 %v2607_v2, %v2605_v1  ;;  %3344 = vmatpush3.bf16.msra.mxu0 %v3343_v62  ;;  %v2662_v1 = vld [vmem:[%s5171_s5 + $0x120] sm:$0xff] }
 0x1b4   : > { %v3307_v6 = vpack.c.bf16 %v2612_v4, %v2610_v3  ;;  %3345 = vmatprep.subr.bf16.mxu0 %v3650_v58  ;;  %v2663_v3 = vld [vmem:[%s5171_s5 + $0x128] sm:$0xff] }
 0x1b5   : > { %v3394_v4 = vpack.c.bf16 %v2663_v3, %v2662_v1  ;;  %v2694_v1 = vld [vmem:[%s5171_s5 + $0x220] sm:$0xff] }
 0x1b6   : > { %3270 = vmatpush1.bf16.msra.mxu1 %v3269_v9  ;;  %v2611_v9 = vld [vmem:[%s5169_s3 + $0x410] sm:$0xff] }
 0x1b7   : > { %3272 = vmatprep.subr.bf16.mxu1 %v3271_v10  ;;  %v2614_v10 = vld [vmem:[%s5169_s3 + $0x428] sm:$0xff]  ;;  %v3309_v12 = vpack.c.bf16 %v2611_v9, %v2609_v8  ;;  %v2664_v8 = vld [vmem:[%s5171_s5 + $0x130] sm:$0xff] }
 0x1b8   : > { %v3311_v13 = vpack.c.bf16 %v2616_v11, %v2614_v10  ;;  %v2665_v10 = vld [vmem:[%s5171_s5 + $0x138] sm:$0xff] }
 0x1b9   : > { %v3397_v11 = vpack.c.bf16 %v2665_v10, %v2664_v8  ;;  %v2696_v8 = vld [vmem:[%s5171_s5 + $0x230] sm:$0xff] }
 0x1ba   : > { %3274 = vmatpush1.bf16.msra.mxu1 %v3273_v15  ;;  %v2615_v15 = vld [vmem:[%s5169_s3 + $0x430] sm:$0xff] }
 0x1bb   : > { %3276 = vmatprep.subr.bf16.mxu1 %v3275_v16  ;;  %v2618_v16 = vld [vmem:[%s5169_s3 + $0x448] sm:$0xff]  ;;  %v3313_v18 = vpack.c.bf16 %v2615_v15, %v2613_v14  ;;  %v2666_v14 = vld [vmem:[%s5171_s5 + $0x140] sm:$0xff] }
 0x1bc   : > { %v3315_v19 = vpack.c.bf16 %v2620_v17, %v2618_v16  ;;  %v2667_v16 = vld [vmem:[%s5171_s5 + $0x148] sm:$0xff] }
 0x1bd   : > { %1417 = vmatmul.mubr.f32.vlgmr.msra.gmra.mrb[0].mxu1 %v4334_v42  ;;  %v2592_v42 = vld [vmem:[%s5169_s3 + $0x378] sm:$0xff]  ;;  %v3400_v17 = vpack.c.bf16 %v2667_v16, %v2666_v14  ;;  %v2698_v14 = vld [vmem:[%s5171_s5 + $0x240] sm:$0xff] }
 0x1be   : > { %3278 = vmatpush1.bf16.msra.mxu1 %v3277_v21  ;;  %1422 = vmatprep.mubr.f32.mxu1 %v3649_v7  ;;  %v3287_v38 = vpack.c.bf16 %v2592_v42, %v2590_v36  ;;  %v2619_v21 = vld [vmem:[%s5169_s3 + $0x450] sm:$0xff]  ;;  %v2630_v42 = vld [vmem:[%s5169_s3 + $0x4a8] sm:$0xff] }
 0x1bf   : > { %3280 = vmatprep.subr.bf16.mxu1 %v3279_v23  ;;  %v2622_v23 = vld [vmem:[%s5169_s3 + $0x468] sm:$0xff]  ;;  %v3317_v24 = vpack.c.bf16 %v2619_v21, %v2617_v20  ;;  %v2627_v36 = vld [vmem:[%s5169_s3 + $0x490] sm:$0xff] }
 0x1c0   : > { %v2668_v20 = vld [vmem:[%s5171_s5 + $0x150] sm:$0xff] }
 0x1c1   : > { %1423 = vmatmul.mubr.f32.gmra.mrb[2].mxu1 %v1348_v33  ;;  %v2596_v33 = vld [vmem:[%s5169_s3 + $0x398] sm:$0xff] }
 0x1c2   : > { %3282 = vmatpush1.bf16.msra.mxu1 %v3281_v29  ;;  %1536 = vmatprep.mubr.f32.mxu1 %v3649_v7  ;;  %v3291_v46 = vpack.c.bf16 %v2596_v33, %v2594_v41  ;;  %v2626_v29 = vld [vmem:[%s5169_s3 + $0x488] sm:$0xff]  ;;  %v2631_v41 = vld [vmem:[%s5169_s3 + $0x4b0] sm:$0xff] }
 0x1c3   : > { %3284 = vmatprep.subr.bf16.mxu1 %v3283_v30  ;;  %v3321_v30 = vpack.c.bf16 %v2623_v28, %v2621_v27  ;;  %v2634_v33 = vld [vmem:[%s5169_s3 + $0x4c8] sm:$0xff]  ;;  %v2670_v27 = vld [vmem:[%s5171_s5 + $0x160] sm:$0xff] }
 0x1c6   : > { %3286 = vmatpush1.bf16.msra.mxu1 %v3285_v37  ;;  %v2632_v37 = vld [vmem:[%s5169_s3 + $0x4b8] sm:$0xff] }
 0x1c7   : > { %3288 = vmatprep.subr.bf16.mxu1 %v3287_v38  ;;  %v3325_v38 = vpack.c.bf16 %v2627_v36, %v2625_v32  ;;  %v3327_v39 = vpack.c.bf16 %v2632_v37, %v2630_v42  ;;  %v2672_v32 = vld [vmem:[%s5171_s5 + $0x170] sm:$0xff]  ;;  %v2673_v42 = vld [vmem:[%s5171_s5 + $0x178] sm:$0xff] }
 0x1c8   : > { %v3409_v37 = vpack.c.bf16 %v2673_v42, %v2672_v32  ;;  %v2704_v32 = vld [vmem:[%s5171_s5 + $0x270] sm:$0xff] }
 0x1ca   : > { %3290 = vmatpush1.bf16.msra.mxu1 %v3289_v45  ;;  %v2636_v45 = vld [vmem:[%s5169_s3 + $0x4d8] sm:$0xff] }
 0x1cb   : > { %3292 = vmatprep.subr.bf16.mxu1 %v3291_v46  ;;  %v3329_v46 = vpack.c.bf16 %v2631_v41, %v2629_v40  ;;  %v3331_v22 = vpack.c.bf16 %v2636_v45, %v2634_v33 }
 0x1ce   : > { %3294 = vmatpush1.bf16.msra.mxu1 %v3293_v50  ;;  %v2640_v50 = vld [vmem:[%s5169_s3 + $0x4f8] sm:$0xff] }
 0x1cf   : > { %3296 = vmatprep.subr.bf16.mxu1 %v3295_v51  ;;  %v3333_v51 = vpack.c.bf16 %v2635_v48, %v2633_v47  ;;  %v3335_v52 = vpack.c.bf16 %v2640_v50, %v2638_v49 }
 0x1d2   : > { %3298 = vmatpush1.bf16.msra.mxu1 %v3297_v56  ;;  %v2658_v56 = vld [vmem:[%s5171_s5 + $0x100] sm:$0xff] }
 0x1d3   : > { %3300 = vmatprep.subr.bf16.mxu1 %v3299_v57  ;;  %v2659_v57 = vld [vmem:[%s5171_s5 + $0x108] sm:$0xff] }
 0x1d4   : > { %v3388_v59 = vpack.c.bf16 %v2659_v57, %v2658_v56  ;;  %v3436_v56 = vpack.c.bf16 %v2691_v54, %v2690_v53  ;;  %v1694_v57 = vld [vmem:[%s5171_s5 + $0x10] sm:$0xff]  ;;  %v2682_v53 = vld [vmem:[%s5171_s5 + $0x1c0] sm:$0xff]  ;;  %v2683_v54 = vld [vmem:[%s5171_s5 + $0x1c8] sm:$0xff] }
 0x1d6   : > { %3302 = vmatpush1.bf16.msra.mxu1 %v3301_v63  ;;  %v2661_v63 = vld [vmem:[%s5171_s5 + $0x118] sm:$0xff] }
 0x1d7   : > { %3304 = vmatprep.subr.bf16.mxu1 %v3303_v0 }
 0x1da   : > { %3306 = vmatpush1.bf16.msra.mxu1 %v3305_v5  ;;  %v2648_v5 = vld [vmem:[%s5171_s5 + $0xb0] sm:$0xff] }
 0x1db   : > { %3308 = vmatprep.subr.bf16.mxu1 %v3307_v6  ;;  %v2649_v6 = vld [vmem:[%s5171_s5 + $0xb8] sm:$0xff] }
 0x1dc   : > { %v3349_v9 = vpack.c.bf16 %v2649_v6, %v2648_v5  ;;  %v1698_v5 = vld [vmem:[%s5171_s5 + $0x30] sm:$0xff]  ;;  %v1699_v6 = vld [vmem:[%s5171_s5 + $0x38] sm:$0xff] }
 0x1dd   : > { %1537 = vmatmul.mubr.f32.vlgmr.msra.gmra.mrb[0].mxu1 %v4339_v43  ;;  %v2624_v43 = vld [vmem:[%s5169_s3 + $0x478] sm:$0xff]  ;;  %v3373_v10 = vpack.c.bf16 %v1699_v6, %v1698_v5  ;;  %v2144_v6 = vld [vmem:[%s5173_s7 + $0x20] sm:$0xff] }
 0x1de   : > { %3310 = vmatpush1.bf16.msra.mxu1 %v3309_v12  ;;  %1542 = vmatprep.mubr.f32.mxu1 %v3649_v7  ;;  %v3319_v26 = vpack.c.bf16 %v2624_v43, %v2622_v23  ;;  %v2650_v12 = vld [vmem:[%s5171_s5 + $0xc0] sm:$0xff]  ;;  %v2669_v23 = vld [vmem:[%s5171_s5 + $0x158] sm:$0xff] }
 0x1df   : > { %3312 = vmatprep.subr.bf16.mxu1 %v3311_v13  ;;  %v2651_v13 = vld [vmem:[%s5171_s5 + $0xc8] sm:$0xff]  ;;  %v3403_v43 = vpack.c.bf16 %v2669_v23, %v2668_v20  ;;  %v2700_v20 = vld [vmem:[%s5171_s5 + $0x250] sm:$0xff] }
 0x1e0   : > { %v3352_v15 = vpack.c.bf16 %v2651_v13, %v2650_v12  ;;  %v1700_v12 = vld [vmem:[%s5171_s5 + $0x40] sm:$0xff]  ;;  %v1701_v13 = vld [vmem:[%s5171_s5 + $0x48] sm:$0xff] }
 0x1e1   : > { %1543 = vmatmul.mubr.f32.gmra.mrb[2].mxu1 %v1468_v34  ;;  %v2628_v34 = vld [vmem:[%s5169_s3 + $0x498] sm:$0xff]  ;;  %v3376_v16 = vpack.c.bf16 %v1701_v13, %v1700_v12  ;;  %v2148_v13 = vld [vmem:[%s5173_s7 + $0x40] sm:$0xff] }
 0x1e2   : > { %3314 = vmatpush1.bf16.msra.mxu1 %v3313_v18  ;;  %1656 = vmatprep.mubr.f32.mxu1 %v3649_v7  ;;  %v3323_v31 = vpack.c.bf16 %v2628_v34, %v2626_v29  ;;  %v2652_v18 = vld [vmem:[%s5171_s5 + $0xd0] sm:$0xff]  ;;  %v2671_v29 = vld [vmem:[%s5171_s5 + $0x168] sm:$0xff] }
 0x1e3   : > { %3316 = vmatprep.subr.bf16.mxu1 %v3315_v19  ;;  %v2653_v19 = vld [vmem:[%s5171_s5 + $0xd8] sm:$0xff]  ;;  %v3406_v34 = vpack.c.bf16 %v2671_v29, %v2670_v27  ;;  %v2702_v27 = vld [vmem:[%s5171_s5 + $0x260] sm:$0xff] }
 0x1e4   : > { %v3355_v21 = vpack.c.bf16 %v2653_v19, %v2652_v18  ;;  %v1702_v18 = vld [vmem:[%s5171_s5 + $0x50] sm:$0xff]  ;;  %v1703_v19 = vld [vmem:[%s5171_s5 + $0x58] sm:$0xff] }
 0x1e5   : > { %v3379_v23 = vpack.c.bf16 %v1703_v19, %v1702_v18  ;;  %v2152_v19 = vld [vmem:[%s5173_s7 + $0x60] sm:$0xff] }
 0x1e6   : > { %3318 = vmatpush1.bf16.msra.mxu1 %v3317_v24  ;;  %v2654_v24 = vld [vmem:[%s5171_s5 + $0xe0] sm:$0xff] }
 0x1e7   : > { %3320 = vmatprep.subr.bf16.mxu1 %v3319_v26  ;;  %v2655_v26 = vld [vmem:[%s5171_s5 + $0xe8] sm:$0xff] }
 0x1e8   : > { %v3358_v28 = vpack.c.bf16 %v2655_v26, %v2654_v24  ;;  %v1704_v24 = vld [vmem:[%s5171_s5 + $0x60] sm:$0xff]  ;;  %v1705_v26 = vld [vmem:[%s5171_s5 + $0x68] sm:$0xff] }
 0x1e9   : > { %v3382_v29 = vpack.c.bf16 %v1705_v26, %v1704_v24  ;;  %v2232_v24 = vld [vmem:[%s5175_s9 + $0x8] sm:$0xff]  ;;  %v2233_v26 = vld [vmem:[%s5175_s9 + $0x10] sm:$0xff] }
 0x1ea   : > { %3322 = vmatpush1.bf16.msra.mxu1 %v3321_v30  ;;  %v2656_v30 = vld [vmem:[%s5171_s5 + $0xf0] sm:$0xff] }
 0x1eb   : > { %3324 = vmatprep.subr.bf16.mxu1 %v3323_v31  ;;  %v2657_v31 = vld [vmem:[%s5171_s5 + $0xf8] sm:$0xff] }
 0x1ec   : > { %v3361_v36 = vpack.c.bf16 %v2657_v31, %v2656_v30  ;;  %v1706_v30 = vld [vmem:[%s5171_s5 + $0x70] sm:$0xff]  ;;  %v1707_v31 = vld [vmem:[%s5171_s5 + $0x78] sm:$0xff] }
 0x1ed   : > { %v3385_v42 = vpack.c.bf16 %v1707_v31, %v1706_v30  ;;  %v2236_v30 = vld [vmem:[%s5175_s9 + $0x28] sm:$0xff] }
 0x1ee   : > { %3326 = vmatpush1.bf16.msra.mxu1 %v3325_v38 }
 0x1ef   : > { %3328 = vmatprep.subr.bf16.mxu1 %v3327_v39 }
 0x1f2   : > { %3330 = vmatpush1.bf16.msra.mxu1 %v3329_v46  ;;  %v2641_v46 = vld [vmem:[%s5170_s4] ss:$0 sm:$0xff] }
 0x1f3   : > { %3332 = vmatprep.subr.bf16.mxu1 %v3331_v22 }
 0x1f6   : > { %3334 = vmatpush1.bf16.msra.mxu1 %v3333_v51  ;;  %v1692_v51 = vld [vmem:[%s5171_s5] sm:$0xff] }
 0x1f7   : > { %3336 = vmatprep.subr.bf16.mxu1 %v3335_v52  ;;  %v1693_v52 = vld [vmem:[%s5171_s5 + $0x8] sm:$0xff] }
 0x1fa   : > { %3338 = vmatpush1.bf16.msra.mxu1 %v3337_v55  ;;  %v3364_v55 = vpack.c.bf16 %v1693_v52, %v1692_v51  ;;  %v2681_v51 = vld [vmem:[%s5171_s5 + $0x1b8] sm:$0xff] }
 0x1fb   : > { %3387 = vmatprep.subr.bf16.mxu1 %v3650_v58 }
 0x1fd   : > { %1657 = vmatmul.mubr.f32.vlgmr.msra.gmra.mrb[0].mxu1 %v4344_v44  ;;  %v2660_v44 = vld [vmem:[%s5171_s5 + $0x110] sm:$0xff] }
 0x1fe   : > { %1662 = vmatprep.mubr.f32.mxu1 %v3649_v7  ;;  %3389 = vmatpush3.bf16.msra.mxu1 %v3388_v59  ;;  %v3391_v0 = vpack.c.bf16 %v2661_v63, %v2660_v44  ;;  %v1695_v59 = vld [vmem:[%s5171_s5 + $0x18] sm:$0xff] }
 0x1ff   : > { %3390 = vmatprep.subr.bf16.mxu1 %v3650_v58  ;;  %v3367_v63 = vpack.c.bf16 %v1695_v59, %v1694_v57  ;;  %v2685_v57 = vld [vmem:[%s5171_s5 + $0x1d8] sm:$0xff] }
 0x201   : > { %1663 = vmatmul.mubr.f32.gmra.mrb[2].mxu1 %v1588_v35  ;;  %v2647_v35 = vld [vmem:[%s5171_s5 + $0xa8] sm:$0xff] }
 0x202   : > { %3392 = vmatpush3.bf16.msra.mxu1 %v3391_v0  ;;  %v3346_v2 = vpack.c.bf16 %v2647_v35, %v2646_v25  ;;  %2928 = vmatprep.mubr.msk.f32.mxu1 %vm3651_vm5, %v3649_v7  ;;  %v3439_v0 = vpack.c.bf16 %v2693_v61, %v2692_v60  ;;  %v1696_v25 = vld [vmem:[%s5171_s5 + $0x20] sm:$0xff]  ;;  %v1697_v35 = vld [vmem:[%s5171_s5 + $0x28] sm:$0xff] }
 0x203   : > { %3393 = vmatprep.subr.bf16.mxu1 %v3650_v58  ;;  %v3370_v3 = vpack.c.bf16 %v1697_v35, %v1696_v25  ;;  %v2686_v60 = vld [vmem:[%s5171_s5 + $0x1e0] sm:$0xff]  ;;  %v2687_v61 = vld [vmem:[%s5171_s5 + $0x1e8] sm:$0xff] }
 0x204   : > { %3347 = vmatpush3.bf16.msra.mxu0 %v3346_v2  ;;  %v2695_v2 = vld [vmem:[%s5171_s5 + $0x228] sm:$0xff]  ;;  %v2140_v35 = vld [vmem:[%s5173_s7] sm:$0xff] }
 0x205   : > { %3348 = vmatprep.subr.bf16.mxu0 %v3650_v58 }
 0x206   : > { %3395 = vmatpush3.bf16.msra.mxu1 %v3394_v4  ;;  %v3442_v4 = vpack.c.bf16 %v2695_v2, %v2694_v1  ;;  %v2141_v1 = vld [vmem:[%s5173_s7 + $0x8] sm:$0xff]  ;;  %v2142_v2 = vld [vmem:[%s5173_s7 + $0x10] sm:$0xff] }
 0x207   : > { %3396 = vmatprep.subr.bf16.mxu1 %v3650_v58 }
 0x208   : > { %3350 = vmatpush3.bf16.msra.mxu0 %v3349_v9  ;;  %v2697_v9 = vld [vmem:[%s5171_s5 + $0x238] sm:$0xff] }
 0x209   : > { %3351 = vmatprep.subr.bf16.mxu0 %v3650_v58 }
 0x20a   : > { %3398 = vmatpush3.bf16.msra.mxu1 %v3397_v11  ;;  %v3445_v11 = vpack.c.bf16 %v2697_v9, %v2696_v8  ;;  %v2145_v8 = vld [vmem:[%s5173_s7 + $0x28] sm:$0xff] }
 0x20b   : > { %3399 = vmatprep.subr.bf16.mxu1 %v3650_v58  ;;  %v3466_v9 = vpack.c.bf16 %v2145_v8, %v2144_v6 }
 0x20c   : > { %3353 = vmatpush3.bf16.msra.mxu0 %v3352_v15  ;;  %v2699_v15 = vld [vmem:[%s5171_s5 + $0x248] sm:$0xff] }
 0x20d   : > { %3354 = vmatprep.subr.bf16.mxu0 %v3650_v58 }
 0x20e   : > { %3401 = vmatpush3.bf16.msra.mxu1 %v3400_v17  ;;  %v3448_v17 = vpack.c.bf16 %v2699_v15, %v2698_v14  ;;  %v2149_v14 = vld [vmem:[%s5173_s7 + $0x48] sm:$0xff] }
 0x20f   : > { %3402 = vmatprep.subr.bf16.mxu1 %v3650_v58  ;;  %v3472_v15 = vpack.c.bf16 %v2149_v14, %v2148_v13 }
 0x210   : > { %3356 = vmatpush3.bf16.msra.mxu0 %v3355_v21  ;;  %v2701_v21 = vld [vmem:[%s5171_s5 + $0x258] sm:$0xff] }
 0x211   : > { %3357 = vmatprep.subr.bf16.mxu0 %v3650_v58 }
 0x212   : > { %3404 = vmatpush3.bf16.msra.mxu1 %v3403_v43  ;;  %v3451_v43 = vpack.c.bf16 %v2701_v21, %v2700_v20  ;;  %v2153_v20 = vld [vmem:[%s5173_s7 + $0x68] sm:$0xff] }
 0x213   : > { %3405 = vmatprep.subr.bf16.mxu1 %v3650_v58  ;;  %v3478_v21 = vpack.c.bf16 %v2153_v20, %v2152_v19 }
 0x214   : > { %3359 = vmatpush3.bf16.msra.mxu0 %v3358_v28  ;;  %v2703_v28 = vld [vmem:[%s5171_s5 + $0x268] sm:$0xff] }
 0x215   : > { %3360 = vmatprep.subr.bf16.mxu0 %v3650_v58 }
 0x216   : > { %3407 = vmatpush3.bf16.msra.mxu1 %v3406_v34  ;;  %v3454_v34 = vpack.c.bf16 %v2703_v28, %v2702_v27  ;;  %v2234_v28 = vld [vmem:[%s5175_s9 + $0x18] sm:$0xff] }
 0x217   : > { %3408 = vmatprep.subr.bf16.mxu1 %v3650_v58 }
 0x218   : > { %3362 = vmatpush3.bf16.msra.mxu0 %v3361_v36  ;;  %v2705_v36 = vld [vmem:[%s5171_s5 + $0x278] sm:$0xff] }
 0x219   : > { %3363 = vmatprep.subr.bf16.mxu0 %v3650_v58 }
 0x21a   : > { %3410 = vmatpush3.bf16.msra.mxu1 %v3409_v37  ;;  %v3457_v37 = vpack.c.bf16 %v2705_v36, %v2704_v32  ;;  %v2237_v32 = vld [vmem:[%s5175_s9 + $0x30] sm:$0xff]  ;;  %v2238_v36 = vld [vmem:[%s5175_s9 + $0x38] sm:$0xff] }
 0x21b   : > { %3435 = vmatprep.subr.bf16.mxu1 %v3650_v58 }
 0x2d0   : > { %v1658_v38 = vpop.f32.mrb[0].mxu1 }
 0x2d1   : > { %v1660_v39 = vpop.f32.mrb[1].mxu1 }
 0x2d2   : > { %v1673_v40 = vmax.f32 %v1658_v38, %v1660_v39  ;;  %v2674_v38 = vld [vmem:[%s5171_s5 + $0x180] sm:$0xff]  ;;  %v2675_v39 = vld [vmem:[%s5171_s5 + $0x188] sm:$0xff] }
 0x2d4   : > { %1675 = vst [vmem:[#allocation3] sm:$0xff] %v1673_v40  ;;  %v1664_v41 = vpop.f32.mrb[2].mxu1  ;;  %v3412_v40 = vpack.c.bf16 %v2675_v39, %v2674_v38 }
 0x2d5   : > { %v1666_v33 = vpop.f32.mrb[3].mxu1 }
 0x2d6   : > { %v1674_v45 = vmax.f32 %v1664_v41, %v1666_v33  ;;  %v2676_v41 = vld [vmem:[%s5171_s5 + $0x190] sm:$0xff]  ;;  %v2677_v33 = vld [vmem:[%s5171_s5 + $0x198] sm:$0xff] }
 0x2d8   : > { %1676 = vst [vmem:[#allocation3 + $0x8] sm:$0x3] %v1674_v45 }
 0x2df   : > { %v1677_v22 = vld [vmem:[#allocation3] ss:$2 sm:$0x1f]  ;;  %v1679_v47 = vld [vmem:[#allocation3 + $0x1] ss:$2 sm:$0x1f] }
 0x2e0   : > { %v1680_v48 = vmax.f32 %v1677_v22, %v1679_v47  ;;  %v3415_v22 = vpack.c.bf16 %v2677_v33, %v2676_v41  ;;  %v2678_v47 = vld [vmem:[%s5171_s5 + $0x1a0] sm:$0xff] }
 0x2e2   : > { %v1688_v49 = vadd.f32 %v2641_v46, %v1680_v48  ;;  %v2679_v48 = vld [vmem:[%s5171_s5 + $0x1a8] sm:$0xff] }
 0x2e4   : > { %v1689_v50 = vmax.f32 %v1688_v49, 0.0  ;;  %v3418_v49 = vpack.c.bf16 %v2679_v48, %v2678_v47 }
 0x2e6   : > { %1690 = vst [vmem:[#allocation4] sm:$0x1f] %v1689_v50  ;;  %v2680_v50 = vld [vmem:[%s5171_s5 + $0x1b0] sm:$0xff] }
 0x2e7   : > { %v3421_v52 = vpack.c.bf16 %v2681_v51, %v2680_v50  ;;  %v2137_v51 = vld [vmem:[%s5172_s6] sm:$0x1] }
 0x2ed   : > { %v1709_v44 = vld [vmem:[#allocation4 + $0x1] ss:$5 sm:$0x1]  ;;  %v1868_v62 = vld [vmem:[#allocation4 + $0x2] ss:$5 sm:$0x1] }
 0x2ee   : > { %2859 = vmatmul.mubr.f32.vlgmr.msra.gmra.mrb[8].mxu0 %v1709_v44  ;;  %2929 = vmatmul.mubr.f32.vlgmr.msra.gmra.mrb[4].mxu1 %v1868_v62  ;;  %v1691_v45 = vld [vmem:[#allocation4] ss:$5 sm:$0x1]  ;;  %v2048_v46 = vld [vmem:[#allocation4 + $0x4] ss:$5 sm:$0x1]  ;;  %v3430_v44 = vpack.c.bf16 %v2687_v61, %v2686_v60 }
 0x2ef   : > { %3365 = vmatpush3.bf16.msra.mxu0 %v3364_v55  ;;  %3437 = vmatpush3.bf16.msra.mxu1 %v3436_v56  ;;  %v3424_v55 = vpack.c.bf16 %v2683_v54, %v2682_v53  ;;  %v2684_v56 = vld [vmem:[%s5171_s5 + $0x1d0] sm:$0xff]  ;;  %v2239_v54 = vld [vmem:[%s5175_s9 + $0x40] sm:$0xff] }
 0x2f0   : > { %3366 = vmatprep.subr.bf16.mxu0 %v3650_v58  ;;  %3438 = vmatprep.subr.bf16.mxu1 %v3650_v58  ;;  %v3427_v59 = vpack.c.bf16 %v2685_v57, %v2684_v56  ;;  %v2688_v62 = vld [vmem:[%s5171_s5 + $0x1f0] sm:$0xff] }
 0x2f1   : > { %2893 = vmatprep.mubr.msk.f32.mxu0 %vm3651_vm5, %v3649_v7  ;;  %2998 = vmatprep.mubr.msk.f32.mxu1 %vm3651_vm5, %v3649_v7  ;;  %v1958_v25 = vld [vmem:[#allocation4 + $0x3] ss:$5 sm:$0x1] }
 0x2f2   : > { %v2241_v57 = vld [vmem:[%s5175_s9 + $0x50] sm:$0xf] }
 0x2f3   : > { %3368 = vmatpush3.bf16.msra.mxu0 %v3367_v63  ;;  %3440 = vmatpush3.bf16.msra.mxu1 %v3439_v0  ;;  %v2689_v63 = vld [vmem:[%s5171_s5 + $0x1f8] sm:$0xff] }
 0x2f4   : > { %3369 = vmatprep.subr.bf16.mxu0 %v3650_v58  ;;  %3441 = vmatprep.subr.bf16.mxu1 %v3650_v58  ;;  %v3433_v0 = vpack.c.bf16 %v2689_v63, %v2688_v62 }
 0x2f7   : > { %3371 = vmatpush3.bf16.msra.mxu0 %v3370_v3  ;;  %3443 = vmatpush3.bf16.msra.mxu1 %v3442_v4  ;;  %v3460_v3 = vpack.c.bf16 %v2141_v1, %v2140_v35  ;;  %v2143_v4 = vld [vmem:[%s5173_s7 + $0x18] sm:$0xff] }
 0x2f8   : > { %3372 = vmatprep.subr.bf16.mxu0 %v3650_v58  ;;  %3444 = vmatprep.subr.bf16.mxu1 %v3650_v58  ;;  %v3463_v5 = vpack.c.bf16 %v2143_v4, %v2142_v2 }
 0x2fb   : > { %3374 = vmatpush3.bf16.msra.mxu0 %v3373_v10  ;;  %3446 = vmatpush3.bf16.msra.mxu1 %v3445_v11  ;;  %v2146_v10 = vld [vmem:[%s5173_s7 + $0x30] sm:$0xff]  ;;  %v2147_v11 = vld [vmem:[%s5173_s7 + $0x38] sm:$0xff] }
 0x2fc   : > { %3375 = vmatprep.subr.bf16.mxu0 %v3650_v58  ;;  %3447 = vmatprep.subr.bf16.mxu1 %v3650_v58  ;;  %v3469_v12 = vpack.c.bf16 %v2147_v11, %v2146_v10 }
 0x2ff   : > { %3377 = vmatpush3.bf16.msra.mxu0 %v3376_v16  ;;  %3449 = vmatpush3.bf16.msra.mxu1 %v3448_v17  ;;  %v2150_v16 = vld [vmem:[%s5173_s7 + $0x50] sm:$0xff]  ;;  %v2151_v17 = vld [vmem:[%s5173_s7 + $0x58] sm:$0xff] }
 0x300   : > { %3378 = vmatprep.subr.bf16.mxu0 %v3650_v58  ;;  %3450 = vmatprep.subr.bf16.mxu1 %v3650_v58  ;;  %v3475_v18 = vpack.c.bf16 %v2151_v17, %v2150_v16 }
 0x303   : > { %3380 = vmatpush3.bf16.msra.mxu0 %v3379_v23  ;;  %3452 = vmatpush3.bf16.msra.mxu1 %v3451_v43  ;;  %v2154_v23 = vld [vmem:[%s5173_s7 + $0x70] sm:$0xff]  ;;  %v2231_v43 = vld [vmem:[%s5175_s9] sm:$0xff] }
 0x304   : > { %3381 = vmatprep.subr.bf16.mxu0 %v3650_v58  ;;  %3453 = vmatprep.subr.bf16.mxu1 %v3650_v58  ;;  %v3481_v27 = vpack.c.bf16 %v2232_v24, %v2231_v43 }
 0x307   : > { %3383 = vmatpush3.bf16.msra.mxu0 %v3382_v29  ;;  %3455 = vmatpush3.bf16.msra.mxu1 %v3454_v34  ;;  %v3484_v29 = vpack.c.bf16 %v2234_v28, %v2233_v26  ;;  %v2235_v34 = vld [vmem:[%s5175_s9 + $0x20] sm:$0xff] }
 0x308   : > { %3384 = vmatprep.subr.bf16.mxu0 %v3650_v58  ;;  %3456 = vmatprep.subr.bf16.mxu1 %v3650_v58  ;;  %v3487_v31 = vpack.c.bf16 %v2236_v30, %v2235_v34 }
 0x30b   : > { %3386 = vmatpush3.bf16.msra.mxu0 %v3385_v42  ;;  %3458 = vmatpush3.bf16.msra.mxu1 %v3457_v37  ;;  %v3490_v42 = vpack.c.bf16 %v2238_v36, %v2237_v32 }
 0x30c   : > { %3411 = vmatprep.subr.bf16.mxu0 %v3650_v58  ;;  %3480 = vmatprep.subr.bf16.mxu1 %v3650_v58 }
 0x30e   : > { %2894 = vmatmul.mubr.f32.vlgmr.msra.gmra.mrb[10].mxu0 %v1691_v45  ;;  %2999 = vmatmul.mubr.f32.vlgmr.msra.gmra.mrb[6].mxu1 %v2048_v46 }
 0x30f   : > { %3413 = vmatpush3.bf16.msra.mxu0 %v3412_v40  ;;  %2963 = vmatprep.mubr.msk.f32.mxu0 %vm3651_vm5, %v3649_v7 }
 0x310   : > { %3414 = vmatprep.subr.bf16.mxu0 %v3650_v58  ;;  %3056 = vmatprep.mubr.msk.f32.mxu1 %vm3651_vm5, %v3649_v7 }
 0x311   : > { %3482 = vmatpush3.bf16.msra.mxu1 %v3481_v27 }
 0x312   : > { %3483 = vmatprep.subr.bf16.mxu1 %v3650_v58 }
 0x313   : > { %3416 = vmatpush3.bf16.msra.mxu0 %v3415_v22 }
 0x314   : > { %3417 = vmatprep.subr.bf16.mxu0 %v3650_v58 }
 0x315   : > { %3485 = vmatpush3.bf16.msra.mxu1 %v3484_v29 }
 0x316   : > { %3486 = vmatprep.subr.bf16.mxu1 %v3650_v58 }
 0x317   : > { %3419 = vmatpush3.bf16.msra.mxu0 %v3418_v49 }
 0x318   : > { %3420 = vmatprep.subr.bf16.mxu0 %v3650_v58 }
 0x319   : > { %3488 = vmatpush3.bf16.msra.mxu1 %v3487_v31 }
 0x31a   : > { %3489 = vmatprep.subr.bf16.mxu1 %v3650_v58 }
 0x31b   : > { %3422 = vmatpush3.bf16.msra.mxu0 %v3421_v52 }
 0x31c   : > { %3423 = vmatprep.subr.bf16.mxu0 %v3650_v58 }
 0x31d   : > { %3491 = vmatpush3.bf16.msra.mxu1 %v3490_v42 }
 0x31e   : > { %3492 = vmatprep.subr.bf16.mxu1 %v3650_v58 }
 0x31f   : > { %3425 = vmatpush3.bf16.msra.mxu0 %v3424_v55  ;;  %v2240_v55 = vld [vmem:[%s5175_s9 + $0x48] sm:$0xff] }
 0x320   : > { %3426 = vmatprep.subr.bf16.mxu0 %v3650_v58  ;;  %v3493_v56 = vpack.c.bf16 %v2240_v55, %v2239_v54 }
 0x322   : > { %3494 = vmatpush3.bf16.msra.mxu1 %v3493_v56 }
 0x323   : > { %3428 = vmatpush3.bf16.msra.mxu0 %v3427_v59  ;;  %3054 = vmatprep.subr.mxu1 %v3649_v7  ;;  %v2155_v59 = vld [vmem:[%s5174_s8] sm:$0x1] }
 0x324   : > { %3429 = vmatprep.subr.bf16.mxu0 %v3650_v58 }
 0x326   : > { %3055 = vmatpush3.msk.msra.mxu1 %vm1586_vm4, %v2241_v57 }
 0x327   : > { %3431 = vmatpush3.bf16.msra.mxu0 %v3430_v44 }
 0x328   : > { %3432 = vmatprep.subr.bf16.mxu0 %v3650_v58 }
 0x32b   : > { %3434 = vmatpush3.bf16.msra.mxu0 %v3433_v0 }
 0x32c   : > { %3459 = vmatprep.subr.bf16.mxu0 %v3650_v58 }
 0x32e   : > { %2964 = vmatmul.mubr.f32.vlgmr.msra.gmra.mrb[12].mxu0 %v1958_v25 }
 0x32f   : > { %3031 = vmatprep.mubr.msk.f32.mxu0 %vm3651_vm5, %v3649_v7  ;;  %3461 = vmatpush3.bf16.msra.mxu0 %v3460_v3 }
 0x330   : > { %3462 = vmatprep.subr.bf16.mxu0 %v3650_v58 }
 0x333   : > { %3464 = vmatpush3.bf16.msra.mxu0 %v3463_v5 }
 0x334   : > { %3465 = vmatprep.subr.bf16.mxu0 %v3650_v58 }
 0x337   : > { %3467 = vmatpush3.bf16.msra.mxu0 %v3466_v9 }
 0x338   : > { %3468 = vmatprep.subr.bf16.mxu0 %v3650_v58 }
 0x33b   : > { %3470 = vmatpush3.bf16.msra.mxu0 %v3469_v12 }
 0x33c   : > { %3471 = vmatprep.subr.bf16.mxu0 %v3650_v58 }
 0x33f   : > { %3473 = vmatpush3.bf16.msra.mxu0 %v3472_v15 }
 0x340   : > { %3474 = vmatprep.subr.bf16.mxu0 %v3650_v58 }
 0x343   : > { %3476 = vmatpush3.bf16.msra.mxu0 %v3475_v18 }
 0x344   : > { %3477 = vmatprep.subr.bf16.mxu0 %v3650_v58 }
 0x347   : > { %3479 = vmatpush3.bf16.msra.mxu0 %v3478_v21 }
 0x348   : > { %3029 = vmatprep.subr.mxu0 %v3649_v7  ;;  %v2242_v7 = vld [vmem:[%s5176_s10] sm:$0x1] }
 0x34b   : > { %3030 = vmatpush3.msra.mxu0 %v2154_v23 }
 0x3c1   : > { %v1793_v37 = vpop.f32.mrb[8].mxu0  ;;  %v1952_v38 = vpop.f32.mrb[4].mxu1 }
 0x3c2   : > { %v2860_v39 = vpop.f32.mrb[9].mxu0  ;;  %v2930_v40 = vpop.f32.mrb[5].mxu1 }
 0x3e1   : > { %v1863_v41 = vpop.f32.mrb[10].mxu0  ;;  %v2132_v33 = vpop.f32.mrb[6].mxu1 }
 0x3e2   : > { %v1864_v45 = vadd.f32 %v1863_v41, %v1793_v37  ;;  %v2895_v46 = vpop.f32.mrb[11].mxu0  ;;  %v3000_v22 = vpop.f32.mrb[7].mxu1 }
 0x3e4   : > { %v1956_v47 = vadd.f32 %v1952_v38, %v1864_v45 }
 0x401   : > { %v2042_v48 = vpop.f32.mrb[12].mxu0 }
 0x402   : > { %v2046_v49 = vadd.f32 %v2042_v48, %v1956_v47  ;;  %v2965_v50 = vpop.f32.mrb[13].mxu0 }
 0x404   : > { %v2136_v52 = vadd.f32 %v2132_v33, %v2046_v49 }
 0x406   : > { %v2138_v53 = vadd.f32 %v2137_v51, %v2136_v52 }
 0x408   : > { %v2139_v58 = vmax.f32 %v2138_v53, 0.0 }
 0x40a   : > { %3032 = vmatmul.mubr.msk.f32.vlgmr.msra.gmra.mrb[14].mxu0 %vm2156_vm6, %v2139_v58 }
 0x4dd   : > { %v2226_v60 = vpop.f32.mrb[14].mxu0 }
 0x4de   : > { %v2227_v61 = vadd.f32 %v2226_v60, %v2155_v59  ;;  %v3033_v44 = vpop.f32.mrb[15].mxu0 }
 0x4e0   : > { %v2230_v62 = vmax.f32 %v2227_v61, 0.0 }
 0x4e2   : > { %3057 = vmatmul.mubr.msk.f32.vlgmr.msra.gmra.mrb[8].mxu1 %vm2243_vm7, %v2230_v62 }
 0x5b5   : > { %v2316_v63 = vpop.f32.mrb[8].mxu1 }
 0x5b6   : > { %v2317_v0 = vadd.f32 %v2316_v63, %v2242_v7  ;;  %v3058_v25 = vpop.f32.mrb[9].mxu1 }
 0x5b8   : > { %2321 = vst.msk [vmem:[%s378_s26] sm:$0x1] %vm2320_vm8, %v2317_v0 }
 0x5b9   : > { %3598 = shalt.err (!%p3595_p3)
}
 0x5ba   : > { %s3599_s14 = scalar_lea.hbm %s5124_s12, 16  ;;  %s3603_s26 = scalar_lea.hbm %s5177_s11, 32 }
 0x5bb   : > { %p3600_p4 = scmp.ne.s32.totalorder %s5124_s12, %s3599_s14  ;;  %p3604_p9 = scmp.lt.u32.totalorder %s5124_s12, %s5177_s11 }
 0x5bc   : > { %p3605_p10 = scmp.lt.u32.totalorder %s3603_s26, %s3599_s14  ;;  %p3607_p12 = scmp.lt.u32.totalorder %s3599_s14, %s5124_s12 }
 0x5bd   : > { %p3601_p7 = pnand %p3600_p4, %p3751_p5 }
 0x5be   : > { %p3606_p11 = por %p3605_p10, %p3604_p9 }
 0x5bf   : > { %p3602_p8 = pneg %p3601_p7 }
 0x5c0   : > { %p3608_p13 = por %p3607_p12, %p3606_p11 }
 0x5c2   : > { %p3609_p0 = pnand %p3608_p13, %p3602_p8 }
 0x5c4   : > { %3612 = shalt.err (!%p3609_p0)
}
 0x5c5   : > { %3543 = dma.vmem_to_hbm [thread:$0]  (%p3751_p5), %s5126_s29, 16, %s5124_s12, %s2323_s25  }
 0x5c6 PF: > { %p3549_p1 = scmp.ge.s32.totalorder %s3647_s20, 2  ;;  %s2347_s30 = sand.u32 1, %s3635_s17  }
 0x5c7   : > { %s2348_s21 = scalar_lea.sflag [#allocation6], %s2347_s30 }
 0x5c8   : > { %p3546_p2 = pnand %p3549_p1, %p3755_p6 }
 0x5ca   : > { %3630 = dma.done.wait (!%p3546_p2), %s2348_s21, 16  }
 0x5cb   : > { %3632 = vsyncadd (!%p3546_p2), %s2348_s21, 4294967280  ;;  %s5183_s13 = sld [smem:[#allocation8_spill]]  ;;  %s5184_s19 = sld [smem:[#allocation9_spill]] }
 0x5cc   : > { %p21_p3 = scmp.ge.s32.totalorder %s3738_s23, 4   ;;  %s5185_s17 = smov %s3639_s18 }
 0x5cd   : > { %s5187_s20 = smov %s3738_s23 }
 0x5ce   :  { %23 = sbr.rel (!%p21_p3) target bundleno = 3 (0x3), region = 119 }
 0x5d1   : > { %s5186_s18 = smov %s5183_s13 }
 0x5d5   :  { %2352 = vsyncpa [#allocation6], 1 }
 0x5d6   :  { %2354 = vsyncpa [#allocation6 + $0x1], 1 }

</bundles_post_ra>
